<compile_context>
chip_gen: v5e
topology: v5e:2x2
jax: 0.10.0
libtpu: 0.0.40
codegen_flags: <defaults>
</compile_context>

<pallas_src>
import math

import jax
import jax.numpy as jnp
from jax.experimental import pallas as pl
from jax.experimental.pallas import tpu as pltpu

NEG = -1e30          # finite "minus infinity" (avoids NaN on fully masked rows)
NEG_INF = float("-inf")


# ----------------------------- shared math helpers ---------------------------
def _layer_norm(x, gamma, beta, eps=1e-5):
    mu = jnp.mean(x, axis=-1, keepdims=True)
    var = jnp.mean(jnp.square(x - mu), axis=-1, keepdims=True)
    return (x - mu) * jax.lax.rsqrt(var + eps) * gamma + beta


def _gelu(x):
    # TODO(synk): PyTorch activation='gelu' is exact erf-GELU; tanh
    # approximation is used since erf is not guaranteed to lower in Mosaic.
    c = 0.7978845608028654  # sqrt(2/pi)
    return 0.5 * x * (1.0 + jnp.tanh(c * (x + 0.044715 * x * x * x)))


# ------------------------- kernel 1: decoder layers ---------------------------
def _decoder_layers_kernel(xcat_ref, mem_ref, tmask_ref, cmask_ref,
                           w_tt_ref, b_tt_ref,
                           sa_qkv_w_ref, sa_qkv_b_ref, sa_ow_ref, sa_ob_ref,
                           ca_q_w_ref, ca_q_b_ref, ca_kv_w_ref, ca_kv_b_ref,
                           ca_ow_ref, ca_ob_ref,
                           ln_g_ref, ln_b_ref,
                           ff1_w_ref, ff1_b_ref, ff2_w_ref, ff2_b_ref,
                           fln_ref,
                           hid_ref,
                           x_sc, smask_sc, cmask_sc):
    f32 = jnp.float32
    bf16 = jnp.bfloat16

    Bb, T, HE = xcat_ref.shape
    S = mem_ref.shape[1]
    H = hid_ref.shape[-1]
    l = pl.program_id(1)

    # ---- one-time work per batch block (layer 0): masks + target_transform ----
    @pl.when(l == 0)
    def _init():
        qi = jax.lax.broadcasted_iota(jnp.int32, (T, T), 0)
        ki = jax.lax.broadcasted_iota(jnp.int32, (T, T), 1)
        causal = jnp.where(ki <= qi, 0.0, NEG).astype(f32)            # (T, T)
        tpad = jnp.where(tmask_ref[...] > 0.5, 0.0, NEG).astype(f32)  # (Bb,1,T)
        smask_sc[...] = causal[None, :, :] + tpad                     # (Bb,T,T)
        cpad = jnp.where(cmask_ref[...] > 0.5, 0.0, NEG).astype(f32)  # (Bb,1,S)
        cmask_sc[...] = jnp.broadcast_to(cpad, (Bb, T, S))            # (Bb,T,S)
        # fused target_transform: concat([var, emb]) @ [w_ttv; w_tte] + b
        x_sc[...] = (jnp.dot(xcat_ref[...].reshape(Bb * T, HE), w_tt_ref[...],
                             preferred_element_type=f32) + b_tt_ref[...])

    x = x_sc[...]                                                     # (Bb*T, H)

    def attend(q, k, v, add_mask):
        # 1/sqrt(H) is pre-folded into the Q projection weights/biases.
        s = jnp.einsum("bqd,bkd->bqk", q.astype(bf16), k.astype(bf16),
                       preferred_element_type=f32) + add_mask
        s = s - jnp.max(s, axis=-1, keepdims=True)
        e = jnp.exp(s)
        p = e / jnp.sum(e, axis=-1, keepdims=True)                    # exact div
        return jnp.einsum("bqk,bkd->bqd", p.astype(bf16), v.astype(bf16),
                          preferred_element_type=f32)

    # ---------------- self-attention (fused QKV projection) --------------------
    qkv = (jnp.dot(x.astype(bf16), sa_qkv_w_ref[...],
                   preferred_element_type=f32) + sa_qkv_b_ref[...])   # (Bb*T, 3H)
    q = qkv[:, 0 * H:1 * H].reshape(Bb, T, H)
    k = qkv[:, 1 * H:2 * H].reshape(Bb, T, H)
    v = qkv[:, 2 * H:3 * H].reshape(Bb, T, H)
    sa = attend(q, k, v, smask_sc[...]).reshape(Bb * T, H)
    sa = (jnp.dot(sa.astype(bf16), sa_ow_ref[...],
                  preferred_element_type=f32) + sa_ob_ref[...])
    x = _layer_norm(x + sa, ln_g_ref[0], ln_b_ref[0])

    # ---------------- cross-attention (fused KV projection on memory) ----------
    q = (jnp.dot(x.astype(bf16), ca_q_w_ref[...],
                 preferred_element_type=f32) + ca_q_b_ref[...]).reshape(Bb, T, H)
    kv = (jnp.dot(mem_ref[...].reshape(Bb * S, H), ca_kv_w_ref[...],
                  preferred_element_type=f32) + ca_kv_b_ref[...])     # (Bb*S, 2H)
    k = kv[:, 0:H].reshape(Bb, S, H)
    v = kv[:, H:2 * H].reshape(Bb, S, H)
    ca = attend(q, k, v, cmask_sc[...]).reshape(Bb * T, H)
    ca = (jnp.dot(ca.astype(bf16), ca_ow_ref[...],
                  preferred_element_type=f32) + ca_ob_ref[...])
    x = _layer_norm(x + ca, ln_g_ref[1], ln_b_ref[1])

    # ---------------- feed-forward (GELU) --------------------------------------
    h = _gelu(jnp.dot(x.astype(bf16), ff1_w_ref[...],
                      preferred_element_type=f32) + ff1_b_ref[...])
    f = (jnp.dot(h.astype(bf16), ff2_w_ref[...],
                 preferred_element_type=f32) + ff2_b_ref[...])
    x = _layer_norm(x + f, ln_g_ref[2], ln_b_ref[2])

    x_sc[...] = x

    # ---- final TransformerDecoder LayerNorm + hidden writeback ----------------
    @pl.when(l == pl.num_programs(1) - 1)
    def _finalize():
        hid_ref[...] = _layer_norm(x, fln_ref[0], fln_ref[1]).reshape(Bb, T, H)


# --------------------- kernel 2: vocab-tiled output projection ----------------
def _vocab_kernel(hid_ref, w_ref, b_ref, out_ref):
    Bb, T, H = hid_ref.shape
    x = hid_ref[...].reshape(Bb * T, H).astype(jnp.bfloat16)
    y = jnp.dot(x, w_ref[...], preferred_element_type=jnp.float32) + b_ref[...]
    out_ref[...] = y.reshape(Bb, T, out_ref.shape[-1])


# ------------------------------ spec / param helpers --------------------------
def _spec(block_shape, index_map, single_buffer=False):
    if single_buffer:
        try:
            return pl.BlockSpec(block_shape, index_map,
                                pipeline_mode=pl.Buffered(1))
        except TypeError:  # older jax without pipeline_mode kwarg
            pass
    return pl.BlockSpec(block_shape, index_map)


def _vmem_limit_bytes():
    # Per-generation VMEM limit: ~85% of physical, capped at 110 MiB
    # (v7x: ~54 MiB of the 64 MiB per TC; v5e/v6e: ~110 MiB of 128 MiB).
    try:
        cap = getattr(pltpu.get_tpu_info(), "vmem_capacity_bytes", None)
        if cap:
            return min(int(cap * 0.85), 110 * 1024 * 1024)
    except Exception:
        pass
    return None


def _compiler_params(dim_sem):
    kw = dict(dimension_semantics=dim_sem)
    lim = _vmem_limit_bytes()
    if lim is not None:
        kw["vmem_limit_bytes"] = lim
    return pltpu.CompilerParams(**kw)


# --------------------------------- wrapper -----------------------------------
def xfmr_decoder_forward(params, variable_encoding, code_token_encoding,
                         code_token_mask, target_ids, target_mask,
                         block_b=None, tile_v=None):
    B, T0, H = variable_encoding.shape
    S0 = code_token_encoding.shape[1]
    V = params["w_out"].shape[1]
    L = params["sa_w"].shape[0]

    # ---- glue in plain JAX: embedding gather, teacher-forcing shift, concat ---
    emb = jnp.take(params["target_embedding"], target_ids, axis=0)      # (B,T,E)
    emb = jnp.concatenate([jnp.zeros_like(emb[:, :1]), emb[:, :-1]], axis=1)
    xcat = jnp.concatenate([variable_encoding, emb], axis=-1).astype(jnp.bfloat16)
    mem = code_token_encoding.astype(jnp.bfloat16)
    tmask = target_mask.astype(jnp.float32)[:, None, :]                 # (B,1,T)
    cmask = code_token_mask.astype(jnp.float32)[:, None, :]             # (B,1,S)

    # ---- pad T / S to sublane multiples so in-kernel reshapes stay aligned ----
    T = ((T0 + 7) // 8) * 8
    S = ((S0 + 7) // 8) * 8
    if T != T0:
        xcat = jnp.pad(xcat, ((0, 0), (0, T - T0), (0, 0)))
        tmask = jnp.pad(tmask, ((0, 0), (0, 0), (0, T - T0)))
    if S != S0:
        mem = jnp.pad(mem, ((0, 0), (0, S - S0), (0, 0)))
        cmask = jnp.pad(cmask, ((0, 0), (0, 0), (0, S - S0)))

    # ---- block_b: fill a 256-row MXU M tile, keep >=2 grid steps (megacore) ---
    if block_b is None:
        block_b = max(1, pl.cdiv(256, T))
        block_b = min(block_b, B)
        if B >= 2:
            block_b = min(block_b, pl.cdiv(B, 2))
    nb = pl.cdiv(B, block_b)
    Bp = nb * block_b
    if Bp != B:
        pad = Bp - B
        xcat = jnp.pad(xcat, ((0, pad), (0, 0), (0, 0)))
        mem = jnp.pad(mem, ((0, pad), (0, 0), (0, 0)))
        tmask = jnp.pad(tmask, ((0, pad), (0, 0), (0, 0)))
        cmask = jnp.pad(cmask, ((0, pad), (0, 0), (0, 0)))

    # ---- weight fusion / pre-scaling / vocab padding (one-time, in JAX) -------
    scale = 1.0 / math.sqrt(H)           # num_heads == 1 -> head_dim == H
    bf = lambda a: a.astype(jnp.bfloat16)
    w_tt = bf(jnp.concatenate([params["w_ttv"], params["w_tte"]], axis=0))
    b_tt = params["b_tt"]
    sa_qkv_w = bf(jnp.concatenate([params["sa_w"][:, 0] * scale,
                                   params["sa_w"][:, 1],
                                   params["sa_w"][:, 2]], axis=-1))      # (L,H,3H)
    sa_qkv_b = jnp.concatenate([params["sa_b"][:, 0] * scale,
                                params["sa_b"][:, 1],
                                params["sa_b"][:, 2]], axis=-1)          # (L,1,3H)
    ca_q_w = bf(params["ca_w"][:, 0] * scale)
    ca_q_b = params["ca_b"][:, 0] * scale
    ca_kv_w = bf(jnp.concatenate([params["ca_w"][:, 1],
                                  params["ca_w"][:, 2]], axis=-1))       # (L,H,2H)
    ca_kv_b = jnp.concatenate([params["ca_b"][:, 1],
                               params["ca_b"][:, 2]], axis=-1)           # (L,1,2H)
    Vp = ((V + 127) // 128) * 128        # lane-dense output stores
    w_out = bf(jnp.pad(params["w_out"], ((0, 0), (0, Vp - V))))
    b_out = jnp.pad(params["b_out"], ((0, 0), (0, Vp - V)))

    per_batch = [xcat, mem, tmask, cmask]
    layer_weights = [sa_qkv_w, sa_qkv_b, bf(params["sa_ow"]), params["sa_ob"],
                     ca_q_w, ca_q_b, ca_kv_w, ca_kv_b,
                     bf(params["ca_ow"]), params["ca_ob"],
                     params["ln_g"], params["ln_b"],
                     bf(params["ff1_w"]), params["ff1_b"],
                     bf(params["ff2_w"]), params["ff2_b"]]

    def layer_spec(a):
        tail = a.shape[1:]
        return pl.BlockSpec((None,) + tail,
                            lambda b, l, _n=len(tail): (l,) + (0,) * _n)

    def inv_spec(a):
        return _spec(a.shape, lambda b, l, _n=a.ndim: (0,) * _n,
                     single_buffer=True)

    in_specs = ([pl.BlockSpec((block_b,) + a.shape[1:],
                              lambda b, l, _n=a.ndim - 1: (b,) + (0,) * _n)
                 for a in per_batch]
                + [inv_spec(w_tt), inv_spec(b_tt)]
                + [layer_spec(a) for a in layer_weights]
                + [inv_spec(params["fln"])])

    # ---- pass 1: decoder layers (weights streamed over the layer grid axis) ---
    hidden = pl.pallas_call(
        _decoder_layers_kernel,
        out_shape=jax.ShapeDtypeStruct((Bp, T, H), jnp.float32),
        grid=(nb, L),
        in_specs=in_specs,
        out_specs=pl.BlockSpec((block_b, T, H), lambda b, l: (b, 0, 0)),
        scratch_shapes=[pltpu.VMEM((block_b * T, H), jnp.float32),   # hidden x
                        pltpu.VMEM((block_b, T, T), jnp.float32),    # self mask
                        pltpu.VMEM((block_b, T, S), jnp.float32)],   # cross mask
        compiler_params=_compiler_params(("parallel", "arbitrary")),
    )(xcat, mem, tmask, cmask, w_tt, b_tt, *layer_weights, params["fln"])

    # ---- pass 2: vocab projection, tiled over (batch, vocab) ------------------
    if tile_v is None:
        tile_v = 128
        cand = min(Vp, 2048)
        while cand >= 128:
            if Vp % cand == 0:
                tile_v = cand
                break
            cand -= 128
    nv = Vp // tile_v

    logits = pl.pallas_call(
        _vocab_kernel,
        out_shape=jax.ShapeDtypeStruct((Bp, T, Vp), jnp.float32),
        grid=(nb, nv),
        in_specs=[pl.BlockSpec((block_b, T, H), lambda b, v: (b, 0, 0)),
                  pl.BlockSpec((H, tile_v), lambda b, v: (0, v)),
                  pl.BlockSpec((1, tile_v), lambda b, v: (0, v))],
        out_specs=pl.BlockSpec((block_b, T, tile_v), lambda b, v: (b, 0, v)),
        compiler_params=_compiler_params(("parallel", "arbitrary")),
    )(hidden, w_out, b_out)

    return logits[:B, :T0, :V]


# ------------------------- pure-JAX reference (check) -------------------------
def _ref_forward(params, variable_encoding, code_token_encoding,
                 code_token_mask, target_ids, target_mask):
    B, T, H = variable_encoding.shape
    emb = jnp.take(params["target_embedding"], target_ids, axis=0)
    emb = jnp.concatenate([jnp.zeros_like(emb[:, :1]), emb[:, :-1]], axis=1)
    x = (variable_encoding @ params["w_ttv"] + emb @ params["w_tte"]
         + params["b_tt"])
    causal = jnp.where(jnp.tril(jnp.ones((T, T), dtype=bool)), 0.0, NEG_INF)
    smask = causal[None] + jnp.where(target_mask, 0.0, NEG_INF)[:, None, :]
    cmask = jnp.where(code_token_mask, 0.0, NEG_INF)[:, None, :]
    scale = 1.0 / math.sqrt(H)
    mem = code_token_encoding

    def softmax(s):
        s = s - jnp.max(s, axis=-1, keepdims=True)
        e = jnp.exp(s)
        return e / jnp.sum(e, axis=-1, keepdims=True)

    for l in range(params["sa_w"].shape[0]):
        w, b = params["sa_w"][l], params["sa_b"][l]
        q, k, v = x @ w[0] + b[0], x @ w[1] + b[1], x @ w[2] + b[2]
        sa = softmax(jnp.einsum("btd,bsd->bts", q, k) * scale + smask) @ v
        sa = sa @ params["sa_ow"][l] + params["sa_ob"][l]
        x = _layer_norm(x + sa, params["ln_g"][l, 0], params["ln_b"][l, 0])

        w, b = params["ca_w"][l], params["ca_b"][l]
        q, k, v = x @ w[0] + b[0], mem @ w[1] + b[1], mem @ w[2] + b[2]
        ca = softmax(jnp.einsum("btd,bsd->bts", q, k) * scale + cmask) @ v
        ca = ca @ params["ca_ow"][l] + params["ca_ob"][l]
        x = _layer_norm(x + ca, params["ln_g"][l, 1], params["ln_b"][l, 1])

        h = _gelu(x @ params["ff1_w"][l] + params["ff1_b"][l])
        f = h @ params["ff2_w"][l] + params["ff2_b"][l]
        x = _layer_norm(x + f, params["ln_g"][l, 2], params["ln_b"][l, 2])

    x = _layer_norm(x, params["fln"][0], params["fln"][1])
    return x @ params["w_out"] + params["b_out"]


# ---------------------------- deterministic init ------------------------------
def init_params(key, vocab_size, embed_size, hidden_size, num_layers):
    H, E, V, L = hidden_size, embed_size, vocab_size, num_layers
    F = 4 * H
    ks = iter(jax.random.split(key, 24))

    def w(shape, scale=0.05):
        return scale * jax.random.normal(next(ks), shape, jnp.float32)

    return dict(
        target_embedding=w((V, E), 0.1),
        w_ttv=w((H, H)), w_tte=w((E, H)), b_tt=w((1, H), 0.02),
        sa_w=w((L, 3, H, H)), sa_b=w((L, 3, 1, H), 0.02),
        sa_ow=w((L, H, H)), sa_ob=w((L, 1, H), 0.02),
        ca_w=w((L, 3, H, H)), ca_b=w((L, 3, 1, H), 0.02),
        ca_ow=w((L, H, H)), ca_ob=w((L, 1, H), 0.02),
        ln_g=jnp.ones((L, 3, 1, H), jnp.float32),
        ln_b=jnp.zeros((L, 3, 1, H), jnp.float32),
        ff1_w=w((L, H, F)), ff1_b=w((L, 1, F), 0.02),
        ff2_w=w((L, F, H)), ff2_b=w((L, 1, H), 0.02),
        fln=jnp.concatenate([jnp.ones((1, 1, H), jnp.float32),
                             jnp.zeros((1, 1, H), jnp.float32)], axis=0),
        w_out=w((H, V)), b_out=w((1, V), 0.02),
    )


# ------------------------------------ main -------------------------------------
if __name__ == "__main__":
    B, T, S, H, E, V, L = 2, 8, 16, 32, 32, 48, 2

    key = jax.random.PRNGKey(0)
    k_p, k_var, k_mem, k_ids = jax.random.split(key, 4)
    params = init_params(k_p, vocab_size=V, embed_size=E, hidden_size=H,
                         num_layers=L)

    variable_encoding = jax.random.normal(k_var, (B, T, H), jnp.float32)
    code_token_encoding = jax.random.normal(k_mem, (B, S, H), jnp.float32)
    target_ids = jax.random.randint(k_ids, (B, T), 0, V)           # target_type_id
    target_mask = jnp.arange(T)[None, :] < jnp.array([[T], [5]])   # (B,T) bool
    code_token_mask = jnp.arange(S)[None, :] < jnp.array([[S], [11]])

    logits = xfmr_decoder_forward(params, variable_encoding, code_token_encoding,
                                  code_token_mask, target_ids, target_mask)
    logits = jax.block_until_ready(logits)

    ref = _ref_forward(params, variable_encoding, code_token_encoding,
                       code_token_mask, target_ids, target_mask)

    assert logits.shape == (B, T, V)
    assert bool(jnp.all(jnp.isfinite(logits)))
    # bf16 matmuls (f32 accumulate) vs pure-f32 reference -> slightly looser tol
    assert bool(jnp.allclose(logits, ref, atol=5e-2, rtol=5e-2))
    print("KERNEL_OK")
</pallas_src>

<mosaic_0001>
module attributes {stable_mosaic.version = 11 : i64} {
  func.func @_decoder_layers_kernel(%arg0: i32, %arg1: i32, %arg2: memref<1x8x64xbf16, #tpu.memory_space<vmem>>, %arg3: memref<1x16x32xbf16, #tpu.memory_space<vmem>>, %arg4: memref<1x1x8xf32, #tpu.memory_space<vmem>>, %arg5: memref<1x1x16xf32, #tpu.memory_space<vmem>>, %arg6: memref<64x32xbf16, #tpu.memory_space<vmem>>, %arg7: memref<1x32xf32, #tpu.memory_space<vmem>>, %arg8: memref<1x32x96xbf16, #tpu.memory_space<vmem>>, %arg9: memref<1x1x96xf32, #tpu.memory_space<vmem>>, %arg10: memref<1x32x32xbf16, #tpu.memory_space<vmem>>, %arg11: memref<1x1x32xf32, #tpu.memory_space<vmem>>, %arg12: memref<1x32x32xbf16, #tpu.memory_space<vmem>>, %arg13: memref<1x1x32xf32, #tpu.memory_space<vmem>>, %arg14: memref<1x32x64xbf16, #tpu.memory_space<vmem>>, %arg15: memref<1x1x64xf32, #tpu.memory_space<vmem>>, %arg16: memref<1x32x32xbf16, #tpu.memory_space<vmem>>, %arg17: memref<1x1x32xf32, #tpu.memory_space<vmem>>, %arg18: memref<1x3x1x32xf32, #tpu.memory_space<vmem>>, %arg19: memref<1x3x1x32xf32, #tpu.memory_space<vmem>>, %arg20: memref<1x32x128xbf16, #tpu.memory_space<vmem>>, %arg21: memref<1x1x128xf32, #tpu.memory_space<vmem>>, %arg22: memref<1x128x32xbf16, #tpu.memory_space<vmem>>, %arg23: memref<1x1x32xf32, #tpu.memory_space<vmem>>, %arg24: memref<2x1x32xf32, #tpu.memory_space<vmem>>, %arg25: memref<1x8x32xf32, #tpu.memory_space<vmem>>, %arg26: memref<8x32xf32, #tpu.memory_space<vmem>>, %arg27: memref<1x8x8xf32, #tpu.memory_space<vmem>>, %arg28: memref<1x8x16xf32, #tpu.memory_space<vmem>>) attributes {dimension_semantics = [#tpu.dimension_semantics<parallel>, #tpu.dimension_semantics<arbitrary>], iteration_bounds = array<i64: 2, 2>, scalar_prefetch = 0 : i64, scratch_operands = 3 : i64, tpu.core_type = #tpu.core_type<tc>, window_params = [{transform_indices = @transform_0, window_bounds = array<i64: 1, 8, 64>}, {transform_indices = @transform_1, window_bounds = array<i64: 1, 16, 32>}, {transform_indices = @transform_2, window_bounds = array<i64: 1, 1, 8>}, {transform_indices = @transform_3, window_bounds = array<i64: 1, 1, 16>}, {pipeline_mode = #tpu.pipeline_mode<synchronous>, transform_indices = @transform_4, window_bounds = array<i64: 64, 32>}, {pipeline_mode = #tpu.pipeline_mode<synchronous>, transform_indices = @transform_5, window_bounds = array<i64: 1, 32>}, {transform_indices = @transform_6, window_bounds = array<i64: 1, 32, 96>}, {transform_indices = @transform_7, window_bounds = array<i64: 1, 1, 96>}, {transform_indices = @transform_8, window_bounds = array<i64: 1, 32, 32>}, {transform_indices = @transform_9, window_bounds = array<i64: 1, 1, 32>}, {transform_indices = @transform_10, window_bounds = array<i64: 1, 32, 32>}, {transform_indices = @transform_11, window_bounds = array<i64: 1, 1, 32>}, {transform_indices = @transform_12, window_bounds = array<i64: 1, 32, 64>}, {transform_indices = @transform_13, window_bounds = array<i64: 1, 1, 64>}, {transform_indices = @transform_14, window_bounds = array<i64: 1, 32, 32>}, {transform_indices = @transform_15, window_bounds = array<i64: 1, 1, 32>}, {transform_indices = @transform_16, window_bounds = array<i64: 1, 3, 1, 32>}, {transform_indices = @transform_17, window_bounds = array<i64: 1, 3, 1, 32>}, {transform_indices = @transform_18, window_bounds = array<i64: 1, 32, 128>}, {transform_indices = @transform_19, window_bounds = array<i64: 1, 1, 128>}, {transform_indices = @transform_20, window_bounds = array<i64: 1, 128, 32>}, {transform_indices = @transform_21, window_bounds = array<i64: 1, 1, 32>}, {pipeline_mode = #tpu.pipeline_mode<synchronous>, transform_indices = @transform_22, window_bounds = array<i64: 2, 1, 32>}, {transform_indices = @transform_23, window_bounds = array<i64: 1, 8, 32>}]} {
    %c0_i32 = arith.constant 0 : i32
    %0 = arith.cmpi eq, %arg1, %c0_i32 : i32
    %1 = arith.extui %0 : i1 to i32
    %c0_i32_0 = arith.constant 0 : i32
    %2 = arith.cmpi ne, %1, %c0_i32_0 : i32
    scf.if %2 {
      %206 = tpu.iota {dimensions = array<i32: 0>} : vector<8x8xi32>
      %207 = tpu.iota {dimensions = array<i32: 1>} : vector<8x8xi32>
      %208 = arith.cmpi sle, %207, %206 : vector<8x8xi32>
      %cst_111 = arith.constant 0.000000e+00 : f32
      %cst_112 = arith.constant -1.000000e+30 : f32
      %209 = vector.broadcast %cst_111 : f32 to vector<8x8xf32>
      %210 = vector.broadcast %cst_112 : f32 to vector<8x8xf32>
      %211 = arith.select %208, %209, %210 : vector<8x8xi1>, vector<8x8xf32>
      %c0_113 = arith.constant 0 : index
      %c0_114 = arith.constant 0 : index
      %c0_115 = arith.constant 0 : index
      %212 = vector.load %arg4[%c0_113, %c0_114, %c0_115] : memref<1x1x8xf32, #tpu.memory_space<vmem>>, vector<1x1x8xf32>
      %cst_116 = arith.constant 5.000000e-01 : f32
      %213 = vector.broadcast %cst_116 : f32 to vector<1x1x8xf32>
      %214 = arith.cmpf ogt, %212, %213 : vector<1x1x8xf32>
      %cst_117 = arith.constant 0.000000e+00 : f32
      %cst_118 = arith.constant -1.000000e+30 : f32
      %215 = vector.broadcast %cst_117 : f32 to vector<1x1x8xf32>
      %216 = vector.broadcast %cst_118 : f32 to vector<1x1x8xf32>
      %217 = arith.select %214, %215, %216 : vector<1x1x8xi1>, vector<1x1x8xf32>
      %218 = vector.shape_cast %211 : vector<8x8xf32> to vector<1x8x8xf32>
      %219 = vector.broadcast %217 : vector<1x1x8xf32> to vector<1x8x8xf32>
      %220 = arith.addf %218, %219 : vector<1x8x8xf32>
      %c0_119 = arith.constant 0 : index
      %c0_120 = arith.constant 0 : index
      %c0_121 = arith.constant 0 : index
      %221 = vector.load %arg27[%c0_119, %c0_120, %c0_121] : memref<1x8x8xf32, #tpu.memory_space<vmem>>, vector<1x8x8xf32>
      tpu.vector_store %arg27[%c0_119, %c0_120, %c0_121], %220 {strides = array<i32>} : memref<1x8x8xf32, #tpu.memory_space<vmem>>, vector<1x8x8xf32>,
      %c0_122 = arith.constant 0 : index
      %c0_123 = arith.constant 0 : index
      %c0_124 = arith.constant 0 : index
      %222 = vector.load %arg5[%c0_122, %c0_123, %c0_124] : memref<1x1x16xf32, #tpu.memory_space<vmem>>, vector<1x1x16xf32>
      %cst_125 = arith.constant 5.000000e-01 : f32
      %223 = vector.broadcast %cst_125 : f32 to vector<1x1x16xf32>
      %224 = arith.cmpf ogt, %222, %223 : vector<1x1x16xf32>
      %cst_126 = arith.constant 0.000000e+00 : f32
      %cst_127 = arith.constant -1.000000e+30 : f32
      %225 = vector.broadcast %cst_126 : f32 to vector<1x1x16xf32>
      %226 = vector.broadcast %cst_127 : f32 to vector<1x1x16xf32>
      %227 = arith.select %224, %225, %226 : vector<1x1x16xi1>, vector<1x1x16xf32>
      %228 = vector.shape_cast %227 : vector<1x1x16xf32> to vector<1x1x16xf32>
      %229 = vector.broadcast %228 : vector<1x1x16xf32> to vector<1x8x16xf32>
      %c0_128 = arith.constant 0 : index
      %c0_129 = arith.constant 0 : index
      %c0_130 = arith.constant 0 : index
      %230 = vector.load %arg28[%c0_128, %c0_129, %c0_130] : memref<1x8x16xf32, #tpu.memory_space<vmem>>, vector<1x8x16xf32>
      tpu.vector_store %arg28[%c0_128, %c0_129, %c0_130], %229 {strides = array<i32>} : memref<1x8x16xf32, #tpu.memory_space<vmem>>, vector<1x8x16xf32>,
      %c0_131 = arith.constant 0 : index
      %c0_132 = arith.constant 0 : index
      %c0_133 = arith.constant 0 : index
      %231 = vector.load %arg2[%c0_131, %c0_132, %c0_133] : memref<1x8x64xbf16, #tpu.memory_space<vmem>>, vector<1x8x64xbf16>
      %232 = vector.shape_cast %231 : vector<1x8x64xbf16> to vector<8x64xbf16>
      %c0_134 = arith.constant 0 : index
      %c0_135 = arith.constant 0 : index
      %233 = vector.load %arg6[%c0_134, %c0_135] : memref<64x32xbf16, #tpu.memory_space<vmem>>, vector<64x32xbf16>
      %cst_136 = arith.constant dense<0.000000e+00> : vector<8x32xf32>
      %234 = tpu.matmul %232, %233, %cst_136 {dimension_numbers = #tpu.dot_dimension_numbers<[1], [0], [0], [1], [0, 0, 1, 1], [], []>} : vector<8x64xbf16>, vector<64x32xbf16>, vector<8x32xf32> -> vector<8x32xf32>
      %c0_137 = arith.constant 0 : index
      %c0_138 = arith.constant 0 : index
      %235 = vector.load %arg7[%c0_137, %c0_138] : memref<1x32xf32, #tpu.memory_space<vmem>>, vector<1x32xf32>
      %236 = vector.broadcast %235 : vector<1x32xf32> to vector<8x32xf32>
      %237 = arith.addf %234, %236 : vector<8x32xf32>
      %c0_139 = arith.constant 0 : index
      %c0_140 = arith.constant 0 : index
      %238 = vector.load %arg26[%c0_139, %c0_140] : memref<8x32xf32, #tpu.memory_space<vmem>>, vector<8x32xf32>
      tpu.vector_store %arg26[%c0_139, %c0_140], %237 {strides = array<i32>} : memref<8x32xf32, #tpu.memory_space<vmem>>, vector<8x32xf32>,
    } else {
    }
    %c0 = arith.constant 0 : index
    %c0_1 = arith.constant 0 : index
    %3 = vector.load %arg26[%c0, %c0_1] : memref<8x32xf32, #tpu.memory_space<vmem>>, vector<8x32xf32>
    %4 = arith.truncf %3 : vector<8x32xf32> to vector<8x32xbf16>
    %c0_2 = arith.constant 0 : index
    %c0_3 = arith.constant 0 : index
    %c0_4 = arith.constant 0 : index
    %5 = vector.load %arg8[%c0_2, %c0_3, %c0_4] : memref<1x32x96xbf16, #tpu.memory_space<vmem>>, vector<1x32x96xbf16>
    %6 = vector.shape_cast %5 : vector<1x32x96xbf16> to vector<32x96xbf16>
    %cst = arith.constant dense<0.000000e+00> : vector<8x96xf32>
    %7 = tpu.matmul %4, %6, %cst {dimension_numbers = #tpu.dot_dimension_numbers<[1], [0], [0], [1], [0, 0, 1, 1], [], []>} : vector<8x32xbf16>, vector<32x96xbf16>, vector<8x96xf32> -> vector<8x96xf32>
    %c0_5 = arith.constant 0 : index
    %c0_6 = arith.constant 0 : index
    %c0_7 = arith.constant 0 : index
    %8 = vector.load %arg9[%c0_5, %c0_6, %c0_7] : memref<1x1x96xf32, #tpu.memory_space<vmem>>, vector<1x1x96xf32>
    %9 = vector.shape_cast %8 : vector<1x1x96xf32> to vector<1x96xf32>
    %10 = vector.broadcast %9 : vector<1x96xf32> to vector<8x96xf32>
    %11 = arith.addf %7, %10 : vector<8x96xf32>
    %12 = vector.extract_strided_slice %11 {offsets = [0, 0], sizes = [8, 32], strides = [1, 1]} : vector<8x96xf32> to vector<8x32xf32>
    %13 = vector.shape_cast %12 : vector<8x32xf32> to vector<1x8x32xf32>
    %14 = vector.extract_strided_slice %11 {offsets = [0, 32], sizes = [8, 32], strides = [1, 1]} : vector<8x96xf32> to vector<8x32xf32>
    %15 = vector.shape_cast %14 : vector<8x32xf32> to vector<1x8x32xf32>
    %16 = vector.extract_strided_slice %11 {offsets = [0, 64], sizes = [8, 32], strides = [1, 1]} : vector<8x96xf32> to vector<8x32xf32>
    %17 = vector.shape_cast %16 : vector<8x32xf32> to vector<1x8x32xf32>
    %c0_8 = arith.constant 0 : index
    %c0_9 = arith.constant 0 : index
    %c0_10 = arith.constant 0 : index
    %18 = vector.load %arg27[%c0_8, %c0_9, %c0_10] : memref<1x8x8xf32, #tpu.memory_space<vmem>>, vector<1x8x8xf32>
    %19 = arith.truncf %13 : vector<1x8x32xf32> to vector<1x8x32xbf16>
    %20 = arith.truncf %15 : vector<1x8x32xf32> to vector<1x8x32xbf16>
    "tpu.trace_start"() <{level = 10 : i32, message = "bqd,bkd->bqk"}> : () -> ()
    %cst_11 = arith.constant dense<0.000000e+00> : vector<1x8x8xf32>
    %21 = tpu.matmul %19, %20, %cst_11 {dimension_numbers = #tpu.dot_dimension_numbers<[2], [2], [1], [1], [0, 0, 0, 1, 1, 1], [0], [0]>} : vector<1x8x32xbf16>, vector<1x8x32xbf16>, vector<1x8x8xf32> -> vector<1x8x8xf32>
    "tpu.trace_stop"() : () -> ()
    %22 = arith.addf %21, %18 : vector<1x8x8xf32>
    %cst_12 = arith.constant dense<0xFF800000> : vector<1x8xf32>
    %23 = vector.multi_reduction <maximumf>, %22, %cst_12 [2] : vector<1x8x8xf32> to vector<1x8xf32>
    %24 = vector.shape_cast %23 : vector<1x8xf32> to vector<1x8x1xf32>
    %25 = vector.broadcast %24 : vector<1x8x1xf32> to vector<1x8x8xf32>
    %26 = arith.subf %22, %25 : vector<1x8x8xf32>
    %27 = math.exp %26 : vector<1x8x8xf32>
    %cst_13 = arith.constant dense<0.000000e+00> : vector<1x8xf32>
    %28 = vector.multi_reduction <add>, %27, %cst_13 [2] : vector<1x8x8xf32> to vector<1x8xf32>
    %29 = vector.shape_cast %28 : vector<1x8xf32> to vector<1x8x1xf32>
    %30 = vector.broadcast %29 : vector<1x8x1xf32> to vector<1x8x8xf32>
    %31 = arith.divf %27, %30 : vector<1x8x8xf32>
    %32 = arith.truncf %31 : vector<1x8x8xf32> to vector<1x8x8xbf16>
    %33 = arith.truncf %17 : vector<1x8x32xf32> to vector<1x8x32xbf16>
    "tpu.trace_start"() <{level = 10 : i32, message = "bqk,bkd->bqd"}> : () -> ()
    %cst_14 = arith.constant dense<0.000000e+00> : vector<1x8x32xf32>
    %34 = tpu.matmul %32, %33, %cst_14 {dimension_numbers = #tpu.dot_dimension_numbers<[2], [1], [1], [2], [0, 0, 0, 1, 1, 2], [0], [0]>} : vector<1x8x8xbf16>, vector<1x8x32xbf16>, vector<1x8x32xf32> -> vector<1x8x32xf32>
    "tpu.trace_stop"() : () -> ()
    %35 = vector.shape_cast %34 : vector<1x8x32xf32> to vector<8x32xf32>
    %36 = arith.truncf %35 : vector<8x32xf32> to vector<8x32xbf16>
    %c0_15 = arith.constant 0 : index
    %c0_16 = arith.constant 0 : index
    %c0_17 = arith.constant 0 : index
    %37 = vector.load %arg10[%c0_15, %c0_16, %c0_17] : memref<1x32x32xbf16, #tpu.memory_space<vmem>>, vector<1x32x32xbf16>
    %38 = vector.shape_cast %37 : vector<1x32x32xbf16> to vector<32x32xbf16>
    %cst_18 = arith.constant dense<0.000000e+00> : vector<8x32xf32>
    %39 = tpu.matmul %36, %38, %cst_18 {dimension_numbers = #tpu.dot_dimension_numbers<[1], [0], [0], [1], [0, 0, 1, 1], [], []>} : vector<8x32xbf16>, vector<32x32xbf16>, vector<8x32xf32> -> vector<8x32xf32>
    %c0_19 = arith.constant 0 : index
    %c0_20 = arith.constant 0 : index
    %c0_21 = arith.constant 0 : index
    %40 = vector.load %arg11[%c0_19, %c0_20, %c0_21] : memref<1x1x32xf32, #tpu.memory_space<vmem>>, vector<1x1x32xf32>
    %41 = vector.shape_cast %40 : vector<1x1x32xf32> to vector<1x32xf32>
    %42 = vector.broadcast %41 : vector<1x32xf32> to vector<8x32xf32>
    %43 = arith.addf %39, %42 : vector<8x32xf32>
    %44 = arith.addf %3, %43 : vector<8x32xf32>
    %c0_22 = arith.constant 0 : index
    %c0_23 = arith.constant 0 : index
    %c0_24 = arith.constant 0 : index
    %c0_25 = arith.constant 0 : index
    %45 = vector.load %arg18[%c0_22, %c0_23, %c0_24, %c0_25] : memref<1x3x1x32xf32, #tpu.memory_space<vmem>>, vector<1x1x1x32xf32>
    %46 = vector.shape_cast %45 : vector<1x1x1x32xf32> to vector<1x32xf32>
    %c0_26 = arith.constant 0 : index
    %c0_27 = arith.constant 0 : index
    %c0_28 = arith.constant 0 : index
    %c0_29 = arith.constant 0 : index
    %47 = vector.load %arg19[%c0_26, %c0_27, %c0_28, %c0_29] : memref<1x3x1x32xf32, #tpu.memory_space<vmem>>, vector<1x1x1x32xf32>
    %48 = vector.shape_cast %47 : vector<1x1x1x32xf32> to vector<1x32xf32>
    %cst_30 = arith.constant dense<0.000000e+00> : vector<8xf32>
    %49 = vector.multi_reduction <add>, %44, %cst_30 [1] : vector<8x32xf32> to vector<8xf32>
    %50 = vector.shape_cast %49 : vector<8xf32> to vector<8x1xf32>
    %cst_31 = arith.constant 3.200000e+01 : f32
    %51 = vector.broadcast %cst_31 : f32 to vector<8x1xf32>
    %52 = arith.divf %50, %51 : vector<8x1xf32>
    %53 = vector.broadcast %52 : vector<8x1xf32> to vector<8x32xf32>
    %54 = arith.subf %44, %53 : vector<8x32xf32>
    %55 = arith.mulf %54, %54 : vector<8x32xf32>
    %cst_32 = arith.constant dense<0.000000e+00> : vector<8xf32>
    %56 = vector.multi_reduction <add>, %55, %cst_32 [1] : vector<8x32xf32> to vector<8xf32>
    %57 = vector.shape_cast %56 : vector<8xf32> to vector<8x1xf32>
    %cst_33 = arith.constant 3.200000e+01 : f32
    %58 = vector.broadcast %cst_33 : f32 to vector<8x1xf32>
    %59 = arith.divf %57, %58 : vector<8x1xf32>
    %60 = vector.broadcast %52 : vector<8x1xf32> to vector<8x32xf32>
    %61 = arith.subf %44, %60 : vector<8x32xf32>
    %cst_34 = arith.constant 9.99999974E-6 : f32
    %62 = vector.broadcast %cst_34 : f32 to vector<8x1xf32>
    %63 = arith.addf %59, %62 : vector<8x1xf32>
    %64 = math.rsqrt %63 : vector<8x1xf32>
    %65 = vector.broadcast %64 : vector<8x1xf32> to vector<8x32xf32>
    %66 = arith.mulf %61, %65 : vector<8x32xf32>
    %67 = vector.broadcast %46 : vector<1x32xf32> to vector<8x32xf32>
    %68 = arith.mulf %66, %67 : vector<8x32xf32>
    %69 = vector.broadcast %48 : vector<1x32xf32> to vector<8x32xf32>
    %70 = arith.addf %68, %69 : vector<8x32xf32>
    %71 = arith.truncf %70 : vector<8x32xf32> to vector<8x32xbf16>
    %c0_35 = arith.constant 0 : index
    %c0_36 = arith.constant 0 : index
    %c0_37 = arith.constant 0 : index
    %72 = vector.load %arg12[%c0_35, %c0_36, %c0_37] : memref<1x32x32xbf16, #tpu.memory_space<vmem>>, vector<1x32x32xbf16>
    %73 = vector.shape_cast %72 : vector<1x32x32xbf16> to vector<32x32xbf16>
    %cst_38 = arith.constant dense<0.000000e+00> : vector<8x32xf32>
    %74 = tpu.matmul %71, %73, %cst_38 {dimension_numbers = #tpu.dot_dimension_numbers<[1], [0], [0], [1], [0, 0, 1, 1], [], []>} : vector<8x32xbf16>, vector<32x32xbf16>, vector<8x32xf32> -> vector<8x32xf32>
    %c0_39 = arith.constant 0 : index
    %c0_40 = arith.constant 0 : index
    %c0_41 = arith.constant 0 : index
    %75 = vector.load %arg13[%c0_39, %c0_40, %c0_41] : memref<1x1x32xf32, #tpu.memory_space<vmem>>, vector<1x1x32xf32>
    %76 = vector.shape_cast %75 : vector<1x1x32xf32> to vector<1x32xf32>
    %77 = vector.broadcast %76 : vector<1x32xf32> to vector<8x32xf32>
    %78 = arith.addf %74, %77 : vector<8x32xf32>
    %79 = vector.shape_cast %78 : vector<8x32xf32> to vector<1x8x32xf32>
    %c0_42 = arith.constant 0 : index
    %c0_43 = arith.constant 0 : index
    %c0_44 = arith.constant 0 : index
    %80 = vector.load %arg3[%c0_42, %c0_43, %c0_44] : memref<1x16x32xbf16, #tpu.memory_space<vmem>>, vector<1x16x32xbf16>
    %81 = vector.shape_cast %80 : vector<1x16x32xbf16> to vector<16x32xbf16>
    %c0_45 = arith.constant 0 : index
    %c0_46 = arith.constant 0 : index
    %c0_47 = arith.constant 0 : index
    %82 = vector.load %arg14[%c0_45, %c0_46, %c0_47] : memref<1x32x64xbf16, #tpu.memory_space<vmem>>, vector<1x32x64xbf16>
    %83 = vector.shape_cast %82 : vector<1x32x64xbf16> to vector<32x64xbf16>
    %cst_48 = arith.constant dense<0.000000e+00> : vector<16x64xf32>
    %84 = tpu.matmul %81, %83, %cst_48 {dimension_numbers = #tpu.dot_dimension_numbers<[1], [0], [0], [1], [0, 0, 1, 1], [], []>} : vector<16x32xbf16>, vector<32x64xbf16>, vector<16x64xf32> -> vector<16x64xf32>
    %c0_49 = arith.constant 0 : index
    %c0_50 = arith.constant 0 : index
    %c0_51 = arith.constant 0 : index
    %85 = vector.load %arg15[%c0_49, %c0_50, %c0_51] : memref<1x1x64xf32, #tpu.memory_space<vmem>>, vector<1x1x64xf32>
    %86 = vector.shape_cast %85 : vector<1x1x64xf32> to vector<1x64xf32>
    %87 = vector.broadcast %86 : vector<1x64xf32> to vector<16x64xf32>
    %88 = arith.addf %84, %87 : vector<16x64xf32>
    %89 = vector.extract_strided_slice %88 {offsets = [0, 0], sizes = [16, 32], strides = [1, 1]} : vector<16x64xf32> to vector<16x32xf32>
    %90 = vector.shape_cast %89 : vector<16x32xf32> to vector<1x16x32xf32>
    %91 = vector.extract_strided_slice %88 {offsets = [0, 32], sizes = [16, 32], strides = [1, 1]} : vector<16x64xf32> to vector<16x32xf32>
    %92 = vector.shape_cast %91 : vector<16x32xf32> to vector<1x16x32xf32>
    %c0_52 = arith.constant 0 : index
    %c0_53 = arith.constant 0 : index
    %c0_54 = arith.constant 0 : index
    %93 = vector.load %arg28[%c0_52, %c0_53, %c0_54] : memref<1x8x16xf32, #tpu.memory_space<vmem>>, vector<1x8x16xf32>
    %94 = arith.truncf %79 : vector<1x8x32xf32> to vector<1x8x32xbf16>
    %95 = arith.truncf %90 : vector<1x16x32xf32> to vector<1x16x32xbf16>
    "tpu.trace_start"() <{level = 10 : i32, message = "bqd,bkd->bqk"}> : () -> ()
    %cst_55 = arith.constant dense<0.000000e+00> : vector<1x8x16xf32>
    %96 = tpu.matmul %94, %95, %cst_55 {dimension_numbers = #tpu.dot_dimension_numbers<[2], [2], [1], [1], [0, 0, 0, 1, 1, 1], [0], [0]>} : vector<1x8x32xbf16>, vector<1x16x32xbf16>, vector<1x8x16xf32> -> vector<1x8x16xf32>
    "tpu.trace_stop"() : () -> ()
    %97 = arith.addf %96, %93 : vector<1x8x16xf32>
    %cst_56 = arith.constant dense<0xFF800000> : vector<1x8xf32>
    %98 = vector.multi_reduction <maximumf>, %97, %cst_56 [2] : vector<1x8x16xf32> to vector<1x8xf32>
    %99 = vector.shape_cast %98 : vector<1x8xf32> to vector<1x8x1xf32>
    %100 = vector.broadcast %99 : vector<1x8x1xf32> to vector<1x8x16xf32>
    %101 = arith.subf %97, %100 : vector<1x8x16xf32>
    %102 = math.exp %101 : vector<1x8x16xf32>
    %cst_57 = arith.constant dense<0.000000e+00> : vector<1x8xf32>
    %103 = vector.multi_reduction <add>, %102, %cst_57 [2] : vector<1x8x16xf32> to vector<1x8xf32>
    %104 = vector.shape_cast %103 : vector<1x8xf32> to vector<1x8x1xf32>
    %105 = vector.broadcast %104 : vector<1x8x1xf32> to vector<1x8x16xf32>
    %106 = arith.divf %102, %105 : vector<1x8x16xf32>
    %107 = arith.truncf %106 : vector<1x8x16xf32> to vector<1x8x16xbf16>
    %108 = arith.truncf %92 : vector<1x16x32xf32> to vector<1x16x32xbf16>
    "tpu.trace_start"() <{level = 10 : i32, message = "bqk,bkd->bqd"}> : () -> ()
    %cst_58 = arith.constant dense<0.000000e+00> : vector<1x8x32xf32>
    %109 = tpu.matmul %107, %108, %cst_58 {dimension_numbers = #tpu.dot_dimension_numbers<[2], [1], [1], [2], [0, 0, 0, 1, 1, 2], [0], [0]>} : vector<1x8x16xbf16>, vector<1x16x32xbf16>, vector<1x8x32xf32> -> vector<1x8x32xf32>
    "tpu.trace_stop"() : () -> ()
    %110 = vector.shape_cast %109 : vector<1x8x32xf32> to vector<8x32xf32>
    %111 = arith.truncf %110 : vector<8x32xf32> to vector<8x32xbf16>
    %c0_59 = arith.constant 0 : index
    %c0_60 = arith.constant 0 : index
    %c0_61 = arith.constant 0 : index
    %112 = vector.load %arg16[%c0_59, %c0_60, %c0_61] : memref<1x32x32xbf16, #tpu.memory_space<vmem>>, vector<1x32x32xbf16>
    %113 = vector.shape_cast %112 : vector<1x32x32xbf16> to vector<32x32xbf16>
    %cst_62 = arith.constant dense<0.000000e+00> : vector<8x32xf32>
    %114 = tpu.matmul %111, %113, %cst_62 {dimension_numbers = #tpu.dot_dimension_numbers<[1], [0], [0], [1], [0, 0, 1, 1], [], []>} : vector<8x32xbf16>, vector<32x32xbf16>, vector<8x32xf32> -> vector<8x32xf32>
    %c0_63 = arith.constant 0 : index
    %c0_64 = arith.constant 0 : index
    %c0_65 = arith.constant 0 : index
    %115 = vector.load %arg17[%c0_63, %c0_64, %c0_65] : memref<1x1x32xf32, #tpu.memory_space<vmem>>, vector<1x1x32xf32>
    %116 = vector.shape_cast %115 : vector<1x1x32xf32> to vector<1x32xf32>
    %117 = vector.broadcast %116 : vector<1x32xf32> to vector<8x32xf32>
    %118 = arith.addf %114, %117 : vector<8x32xf32>
    %119 = arith.addf %70, %118 : vector<8x32xf32>
    %c0_66 = arith.constant 0 : index
    %c1 = arith.constant 1 : index
    %c0_67 = arith.constant 0 : index
    %c0_68 = arith.constant 0 : index
    %120 = vector.load %arg18[%c0_66, %c1, %c0_67, %c0_68] : memref<1x3x1x32xf32, #tpu.memory_space<vmem>>, vector<1x1x1x32xf32>
    %121 = vector.shape_cast %120 : vector<1x1x1x32xf32> to vector<1x32xf32>
    %c0_69 = arith.constant 0 : index
    %c1_70 = arith.constant 1 : index
    %c0_71 = arith.constant 0 : index
    %c0_72 = arith.constant 0 : index
    %122 = vector.load %arg19[%c0_69, %c1_70, %c0_71, %c0_72] : memref<1x3x1x32xf32, #tpu.memory_space<vmem>>, vector<1x1x1x32xf32>
    %123 = vector.shape_cast %122 : vector<1x1x1x32xf32> to vector<1x32xf32>
    %cst_73 = arith.constant dense<0.000000e+00> : vector<8xf32>
    %124 = vector.multi_reduction <add>, %119, %cst_73 [1] : vector<8x32xf32> to vector<8xf32>
    %125 = vector.shape_cast %124 : vector<8xf32> to vector<8x1xf32>
    %cst_74 = arith.constant 3.200000e+01 : f32
    %126 = vector.broadcast %cst_74 : f32 to vector<8x1xf32>
    %127 = arith.divf %125, %126 : vector<8x1xf32>
    %128 = vector.broadcast %127 : vector<8x1xf32> to vector<8x32xf32>
    %129 = arith.subf %119, %128 : vector<8x32xf32>
    %130 = arith.mulf %129, %129 : vector<8x32xf32>
    %cst_75 = arith.constant dense<0.000000e+00> : vector<8xf32>
    %131 = vector.multi_reduction <add>, %130, %cst_75 [1] : vector<8x32xf32> to vector<8xf32>
    %132 = vector.shape_cast %131 : vector<8xf32> to vector<8x1xf32>
    %cst_76 = arith.constant 3.200000e+01 : f32
    %133 = vector.broadcast %cst_76 : f32 to vector<8x1xf32>
    %134 = arith.divf %132, %133 : vector<8x1xf32>
    %135 = vector.broadcast %127 : vector<8x1xf32> to vector<8x32xf32>
    %136 = arith.subf %119, %135 : vector<8x32xf32>
    %cst_77 = arith.constant 9.99999974E-6 : f32
    %137 = vector.broadcast %cst_77 : f32 to vector<8x1xf32>
    %138 = arith.addf %134, %137 : vector<8x1xf32>
    %139 = math.rsqrt %138 : vector<8x1xf32>
    %140 = vector.broadcast %139 : vector<8x1xf32> to vector<8x32xf32>
    %141 = arith.mulf %136, %140 : vector<8x32xf32>
    %142 = vector.broadcast %121 : vector<1x32xf32> to vector<8x32xf32>
    %143 = arith.mulf %141, %142 : vector<8x32xf32>
    %144 = vector.broadcast %123 : vector<1x32xf32> to vector<8x32xf32>
    %145 = arith.addf %143, %144 : vector<8x32xf32>
    %146 = arith.truncf %145 : vector<8x32xf32> to vector<8x32xbf16>
    %c0_78 = arith.constant 0 : index
    %c0_79 = arith.constant 0 : index
    %c0_80 = arith.constant 0 : index
    %147 = vector.load %arg20[%c0_78, %c0_79, %c0_80] : memref<1x32x128xbf16, #tpu.memory_space<vmem>>, vector<1x32x128xbf16>
    %148 = vector.shape_cast %147 : vector<1x32x128xbf16> to vector<32x128xbf16>
    %cst_81 = arith.constant dense<0.000000e+00> : vector<8x128xf32>
    %149 = tpu.matmul %146, %148, %cst_81 {dimension_numbers = #tpu.dot_dimension_numbers<[1], [0], [0], [1], [0, 0, 1, 1], [], []>} : vector<8x32xbf16>, vector<32x128xbf16>, vector<8x128xf32> -> vector<8x128xf32>
    %c0_82 = arith.constant 0 : index
    %c0_83 = arith.constant 0 : index
    %c0_84 = arith.constant 0 : index
    %150 = vector.load %arg21[%c0_82, %c0_83, %c0_84] : memref<1x1x128xf32, #tpu.memory_space<vmem>>, vector<1x1x128xf32>
    %151 = vector.shape_cast %150 : vector<1x1x128xf32> to vector<1x128xf32>
    %152 = vector.broadcast %151 : vector<1x128xf32> to vector<8x128xf32>
    %153 = arith.addf %149, %152 : vector<8x128xf32>
    %cst_85 = arith.constant 5.000000e-01 : f32
    %154 = vector.broadcast %cst_85 : f32 to vector<8x128xf32>
    %155 = arith.mulf %154, %153 : vector<8x128xf32>
    %cst_86 = arith.constant 4.471500e-02 : f32
    %156 = vector.broadcast %cst_86 : f32 to vector<8x128xf32>
    %157 = arith.mulf %156, %153 : vector<8x128xf32>
    %158 = arith.mulf %157, %153 : vector<8x128xf32>
    %159 = arith.mulf %158, %153 : vector<8x128xf32>
    %160 = arith.addf %153, %159 : vector<8x128xf32>
    %cst_87 = arith.constant 0.797884583 : f32
    %161 = vector.broadcast %cst_87 : f32 to vector<8x128xf32>
    %162 = arith.mulf %161, %160 : vector<8x128xf32>
    %163 = math.tanh %162 : vector<8x128xf32>
    %cst_88 = arith.constant 1.000000e+00 : f32
    %164 = vector.broadcast %cst_88 : f32 to vector<8x128xf32>
    %165 = arith.addf %164, %163 : vector<8x128xf32>
    %166 = arith.mulf %155, %165 : vector<8x128xf32>
    %167 = arith.truncf %166 : vector<8x128xf32> to vector<8x128xbf16>
    %c0_89 = arith.constant 0 : index
    %c0_90 = arith.constant 0 : index
    %c0_91 = arith.constant 0 : index
    %168 = vector.load %arg22[%c0_89, %c0_90, %c0_91] : memref<1x128x32xbf16, #tpu.memory_space<vmem>>, vector<1x128x32xbf16>
    %169 = vector.shape_cast %168 : vector<1x128x32xbf16> to vector<128x32xbf16>
    %cst_92 = arith.constant dense<0.000000e+00> : vector<8x32xf32>
    %170 = tpu.matmul %167, %169, %cst_92 {dimension_numbers = #tpu.dot_dimension_numbers<[1], [0], [0], [1], [0, 0, 1, 1], [], []>} : vector<8x128xbf16>, vector<128x32xbf16>, vector<8x32xf32> -> vector<8x32xf32>
    %c0_93 = arith.constant 0 : index
    %c0_94 = arith.constant 0 : index
    %c0_95 = arith.constant 0 : index
    %171 = vector.load %arg23[%c0_93, %c0_94, %c0_95] : memref<1x1x32xf32, #tpu.memory_space<vmem>>, vector<1x1x32xf32>
    %172 = vector.shape_cast %171 : vector<1x1x32xf32> to vector<1x32xf32>
    %173 = vector.broadcast %172 : vector<1x32xf32> to vector<8x32xf32>
    %174 = arith.addf %170, %173 : vector<8x32xf32>
    %175 = arith.addf %145, %174 : vector<8x32xf32>
    %c0_96 = arith.constant 0 : index
    %c2 = arith.constant 2 : index
    %c0_97 = arith.constant 0 : index
    %c0_98 = arith.constant 0 : index
    %176 = vector.load %arg18[%c0_96, %c2, %c0_97, %c0_98] : memref<1x3x1x32xf32, #tpu.memory_space<vmem>>, vector<1x1x1x32xf32>
    %177 = vector.shape_cast %176 : vector<1x1x1x32xf32> to vector<1x32xf32>
    %c0_99 = arith.constant 0 : index
    %c2_100 = arith.constant 2 : index
    %c0_101 = arith.constant 0 : index
    %c0_102 = arith.constant 0 : index
    %178 = vector.load %arg19[%c0_99, %c2_100, %c0_101, %c0_102] : memref<1x3x1x32xf32, #tpu.memory_space<vmem>>, vector<1x1x1x32xf32>
    %179 = vector.shape_cast %178 : vector<1x1x1x32xf32> to vector<1x32xf32>
    %cst_103 = arith.constant dense<0.000000e+00> : vector<8xf32>
    %180 = vector.multi_reduction <add>, %175, %cst_103 [1] : vector<8x32xf32> to vector<8xf32>
    %181 = vector.shape_cast %180 : vector<8xf32> to vector<8x1xf32>
    %cst_104 = arith.constant 3.200000e+01 : f32
    %182 = vector.broadcast %cst_104 : f32 to vector<8x1xf32>
    %183 = arith.divf %181, %182 : vector<8x1xf32>
    %184 = vector.broadcast %183 : vector<8x1xf32> to vector<8x32xf32>
    %185 = arith.subf %175, %184 : vector<8x32xf32>
    %186 = arith.mulf %185, %185 : vector<8x32xf32>
    %cst_105 = arith.constant dense<0.000000e+00> : vector<8xf32>
    %187 = vector.multi_reduction <add>, %186, %cst_105 [1] : vector<8x32xf32> to vector<8xf32>
    %188 = vector.shape_cast %187 : vector<8xf32> to vector<8x1xf32>
    %cst_106 = arith.constant 3.200000e+01 : f32
    %189 = vector.broadcast %cst_106 : f32 to vector<8x1xf32>
    %190 = arith.divf %188, %189 : vector<8x1xf32>
    %191 = vector.broadcast %183 : vector<8x1xf32> to vector<8x32xf32>
    %192 = arith.subf %175, %191 : vector<8x32xf32>
    %cst_107 = arith.constant 9.99999974E-6 : f32
    %193 = vector.broadcast %cst_107 : f32 to vector<8x1xf32>
    %194 = arith.addf %190, %193 : vector<8x1xf32>
    %195 = math.rsqrt %194 : vector<8x1xf32>
    %196 = vector.broadcast %195 : vector<8x1xf32> to vector<8x32xf32>
    %197 = arith.mulf %192, %196 : vector<8x32xf32>
    %198 = vector.broadcast %177 : vector<1x32xf32> to vector<8x32xf32>
    %199 = arith.mulf %197, %198 : vector<8x32xf32>
    %200 = vector.broadcast %179 : vector<1x32xf32> to vector<8x32xf32>
    %201 = arith.addf %199, %200 : vector<8x32xf32>
    %c0_108 = arith.constant 0 : index
    %c0_109 = arith.constant 0 : index
    %202 = vector.load %arg26[%c0_108, %c0_109] : memref<8x32xf32, #tpu.memory_space<vmem>>, vector<8x32xf32>
    tpu.vector_store %arg26[%c0_108, %c0_109], %201 {strides = array<i32>} : memref<8x32xf32, #tpu.memory_space<vmem>>, vector<8x32xf32>,
    %c1_i32 = arith.constant 1 : i32
    %203 = arith.cmpi eq, %arg1, %c1_i32 : i32
    %204 = arith.extui %203 : i1 to i32
    %c0_i32_110 = arith.constant 0 : i32
    %205 = arith.cmpi ne, %204, %c0_i32_110 : i32
    scf.if %205 {
      %c0_111 = arith.constant 0 : index
      %c0_112 = arith.constant 0 : index
      %c0_113 = arith.constant 0 : index
      %206 = vector.load %arg24[%c0_111, %c0_112, %c0_113] : memref<2x1x32xf32, #tpu.memory_space<vmem>>, vector<1x1x32xf32>
      %207 = vector.shape_cast %206 : vector<1x1x32xf32> to vector<1x32xf32>
      %c1_114 = arith.constant 1 : index
      %c0_115 = arith.constant 0 : index
      %c0_116 = arith.constant 0 : index
      %208 = vector.load %arg24[%c1_114, %c0_115, %c0_116] : memref<2x1x32xf32, #tpu.memory_space<vmem>>, vector<1x1x32xf32>
      %209 = vector.shape_cast %208 : vector<1x1x32xf32> to vector<1x32xf32>
      %cst_117 = arith.constant dense<0.000000e+00> : vector<8xf32>
      %210 = vector.multi_reduction <add>, %201, %cst_117 [1] : vector<8x32xf32> to vector<8xf32>
      %211 = vector.shape_cast %210 : vector<8xf32> to vector<8x1xf32>
      %cst_118 = arith.constant 3.200000e+01 : f32
      %212 = vector.broadcast %cst_118 : f32 to vector<8x1xf32>
      %213 = arith.divf %211, %212 : vector<8x1xf32>
      %214 = vector.broadcast %213 : vector<8x1xf32> to vector<8x32xf32>
      %215 = arith.subf %201, %214 : vector<8x32xf32>
      %216 = arith.mulf %215, %215 : vector<8x32xf32>
      %cst_119 = arith.constant dense<0.000000e+00> : vector<8xf32>
      %217 = vector.multi_reduction <add>, %216, %cst_119 [1] : vector<8x32xf32> to vector<8xf32>
      %218 = vector.shape_cast %217 : vector<8xf32> to vector<8x1xf32>
      %cst_120 = arith.constant 3.200000e+01 : f32
      %219 = vector.broadcast %cst_120 : f32 to vector<8x1xf32>
      %220 = arith.divf %218, %219 : vector<8x1xf32>
      %221 = vector.broadcast %213 : vector<8x1xf32> to vector<8x32xf32>
      %222 = arith.subf %201, %221 : vector<8x32xf32>
      %cst_121 = arith.constant 9.99999974E-6 : f32
      %223 = vector.broadcast %cst_121 : f32 to vector<8x1xf32>
      %224 = arith.addf %220, %223 : vector<8x1xf32>
      %225 = math.rsqrt %224 : vector<8x1xf32>
      %226 = vector.broadcast %225 : vector<8x1xf32> to vector<8x32xf32>
      %227 = arith.mulf %222, %226 : vector<8x32xf32>
      %228 = vector.broadcast %207 : vector<1x32xf32> to vector<8x32xf32>
      %229 = arith.mulf %227, %228 : vector<8x32xf32>
      %230 = vector.broadcast %209 : vector<1x32xf32> to vector<8x32xf32>
      %231 = arith.addf %229, %230 : vector<8x32xf32>
      %232 = vector.shape_cast %231 : vector<8x32xf32> to vector<1x8x32xf32>
      %c0_122 = arith.constant 0 : index
      %c0_123 = arith.constant 0 : index
      %c0_124 = arith.constant 0 : index
      %233 = vector.load %arg25[%c0_122, %c0_123, %c0_124] : memref<1x8x32xf32, #tpu.memory_space<vmem>>, vector<1x8x32xf32>
      tpu.vector_store %arg25[%c0_122, %c0_123, %c0_124], %232 {strides = array<i32>} : memref<1x8x32xf32, #tpu.memory_space<vmem>>, vector<1x8x32xf32>,
    } else {
    }
    return
  }
  func.func @transform_0(%arg0: i32, %arg1: i32) -> (i32, i32, i32) {
    %c0_i32 = arith.constant 0 : i32
    %c0_i32_0 = arith.constant 0 : i32
    %c0_i32_1 = arith.constant 0 : i32
    return %arg0, %c0_i32, %c0_i32_0 : i32, i32, i32
  }
  func.func @transform_1(%arg0: i32, %arg1: i32) -> (i32, i32, i32) {
    %c0_i32 = arith.constant 0 : i32
    %c0_i32_0 = arith.constant 0 : i32
    %c0_i32_1 = arith.constant 0 : i32
    return %arg0, %c0_i32, %c0_i32_0 : i32, i32, i32
  }
  func.func @transform_2(%arg0: i32, %arg1: i32) -> (i32, i32, i32) {
    %c0_i32 = arith.constant 0 : i32
    %c0_i32_0 = arith.constant 0 : i32
    %c0_i32_1 = arith.constant 0 : i32
    return %arg0, %c0_i32, %c0_i32_0 : i32, i32, i32
  }
  func.func @transform_3(%arg0: i32, %arg1: i32) -> (i32, i32, i32) {
    %c0_i32 = arith.constant 0 : i32
    %c0_i32_0 = arith.constant 0 : i32
    %c0_i32_1 = arith.constant 0 : i32
    return %arg0, %c0_i32, %c0_i32_0 : i32, i32, i32
  }
  func.func @transform_4(%arg0: i32, %arg1: i32) -> (i32, i32) {
    %c0_i32 = arith.constant 0 : i32
    %c0_i32_0 = arith.constant 0 : i32
    %c0_i32_1 = arith.constant 0 : i32
    return %c0_i32, %c0_i32_0 : i32, i32
  }
  func.func @transform_5(%arg0: i32, %arg1: i32) -> (i32, i32) {
    %c0_i32 = arith.constant 0 : i32
    %c0_i32_0 = arith.constant 0 : i32
    %c0_i32_1 = arith.constant 0 : i32
    return %c0_i32, %c0_i32_0 : i32, i32
  }
  func.func @transform_6(%arg0: i32, %arg1: i32) -> (i32, i32, i32) {
    %c0_i32 = arith.constant 0 : i32
    %c0_i32_0 = arith.constant 0 : i32
    %c0_i32_1 = arith.constant 0 : i32
    return %arg1, %c0_i32, %c0_i32_0 : i32, i32, i32
  }
  func.func @transform_7(%arg0: i32, %arg1: i32) -> (i32, i32, i32) {
    %c0_i32 = arith.constant 0 : i32
    %c0_i32_0 = arith.constant 0 : i32
    %c0_i32_1 = arith.constant 0 : i32
    return %arg1, %c0_i32, %c0_i32_0 : i32, i32, i32
  }
  func.func @transform_8(%arg0: i32, %arg1: i32) -> (i32, i32, i32) {
    %c0_i32 = arith.constant 0 : i32
    %c0_i32_0 = arith.constant 0 : i32
    %c0_i32_1 = arith.constant 0 : i32
    return %arg1, %c0_i32, %c0_i32_0 : i32, i32, i32
  }
  func.func @transform_9(%arg0: i32, %arg1: i32) -> (i32, i32, i32) {
    %c0_i32 = arith.constant 0 : i32
    %c0_i32_0 = arith.constant 0 : i32
    %c0_i32_1 = arith.constant 0 : i32
    return %arg1, %c0_i32, %c0_i32_0 : i32, i32, i32
  }
  func.func @transform_10(%arg0: i32, %arg1: i32) -> (i32, i32, i32) {
    %c0_i32 = arith.constant 0 : i32
    %c0_i32_0 = arith.constant 0 : i32
    %c0_i32_1 = arith.constant 0 : i32
    return %arg1, %c0_i32, %c0_i32_0 : i32, i32, i32
  }
  func.func @transform_11(%arg0: i32, %arg1: i32) -> (i32, i32, i32) {
    %c0_i32 = arith.constant 0 : i32
    %c0_i32_0 = arith.constant 0 : i32
    %c0_i32_1 = arith.constant 0 : i32
    return %arg1, %c0_i32, %c0_i32_0 : i32, i32, i32
  }
  func.func @transform_12(%arg0: i32, %arg1: i32) -> (i32, i32, i32) {
    %c0_i32 = arith.constant 0 : i32
    %c0_i32_0 = arith.constant 0 : i32
    %c0_i32_1 = arith.constant 0 : i32
    return %arg1, %c0_i32, %c0_i32_0 : i32, i32, i32
  }
  func.func @transform_13(%arg0: i32, %arg1: i32) -> (i32, i32, i32) {
    %c0_i32 = arith.constant 0 : i32
    %c0_i32_0 = arith.constant 0 : i32
    %c0_i32_1 = arith.constant 0 : i32
    return %arg1, %c0_i32, %c0_i32_0 : i32, i32, i32
  }
  func.func @transform_14(%arg0: i32, %arg1: i32) -> (i32, i32, i32) {
    %c0_i32 = arith.constant 0 : i32
    %c0_i32_0 = arith.constant 0 : i32
    %c0_i32_1 = arith.constant 0 : i32
    return %arg1, %c0_i32, %c0_i32_0 : i32, i32, i32
  }
  func.func @transform_15(%arg0: i32, %arg1: i32) -> (i32, i32, i32) {
    %c0_i32 = arith.constant 0 : i32
    %c0_i32_0 = arith.constant 0 : i32
    %c0_i32_1 = arith.constant 0 : i32
    return %arg1, %c0_i32, %c0_i32_0 : i32, i32, i32
  }
  func.func @transform_16(%arg0: i32, %arg1: i32) -> (i32, i32, i32, i32) {
    %c0_i32 = arith.constant 0 : i32
    %c0_i32_0 = arith.constant 0 : i32
    %c0_i32_1 = arith.constant 0 : i32
    %c0_i32_2 = arith.constant 0 : i32
    return %arg1, %c0_i32, %c0_i32_0, %c0_i32_1 : i32, i32, i32, i32
  }
  func.func @transform_17(%arg0: i32, %arg1: i32) -> (i32, i32, i32, i32) {
    %c0_i32 = arith.constant 0 : i32
    %c0_i32_0 = arith.constant 0 : i32
    %c0_i32_1 = arith.constant 0 : i32
    %c0_i32_2 = arith.constant 0 : i32
    return %arg1, %c0_i32, %c0_i32_0, %c0_i32_1 : i32, i32, i32, i32
  }
  func.func @transform_18(%arg0: i32, %arg1: i32) -> (i32, i32, i32) {
    %c0_i32 = arith.constant 0 : i32
    %c0_i32_0 = arith.constant 0 : i32
    %c0_i32_1 = arith.constant 0 : i32
    return %arg1, %c0_i32, %c0_i32_0 : i32, i32, i32
  }
  func.func @transform_19(%arg0: i32, %arg1: i32) -> (i32, i32, i32) {
    %c0_i32 = arith.constant 0 : i32
    %c0_i32_0 = arith.constant 0 : i32
    %c0_i32_1 = arith.constant 0 : i32
    return %arg1, %c0_i32, %c0_i32_0 : i32, i32, i32
  }
  func.func @transform_20(%arg0: i32, %arg1: i32) -> (i32, i32, i32) {
    %c0_i32 = arith.constant 0 : i32
    %c0_i32_0 = arith.constant 0 : i32
    %c0_i32_1 = arith.constant 0 : i32
    return %arg1, %c0_i32, %c0_i32_0 : i32, i32, i32
  }
  func.func @transform_21(%arg0: i32, %arg1: i32) -> (i32, i32, i32) {
    %c0_i32 = arith.constant 0 : i32
    %c0_i32_0 = arith.constant 0 : i32
    %c0_i32_1 = arith.constant 0 : i32
    return %arg1, %c0_i32, %c0_i32_0 : i32, i32, i32
  }
  func.func @transform_22(%arg0: i32, %arg1: i32) -> (i32, i32, i32) {
    %c0_i32 = arith.constant 0 : i32
    %c0_i32_0 = arith.constant 0 : i32
    %c0_i32_1 = arith.constant 0 : i32
    %c0_i32_2 = arith.constant 0 : i32
    return %c0_i32, %c0_i32_0, %c0_i32_1 : i32, i32, i32
  }
  func.func @transform_23(%arg0: i32, %arg1: i32) -> (i32, i32, i32) {
    %c0_i32 = arith.constant 0 : i32
    %c0_i32_0 = arith.constant 0 : i32
    %c0_i32_1 = arith.constant 0 : i32
    return %arg0, %c0_i32, %c0_i32_0 : i32, i32, i32
  }
}

</mosaic_0001>

<bundles_post_ra>
// kernel: tpu_custom_call.1
= control target key start
LH: loop header
LB: loop body
LE: loop exit
PB: predicated region body
PF: predicated region fallthrough
CT: control target
= control target key end

     0   :  { %s3984_s0 = inlined_call_operand.hbm [shape: bf16[2,8,64], index: 0, kind: input, shape index: {}]   ;;  %s3985_s1 = inlined_call_operand.hbm [shape: bf16[2,16,32], index: 1, kind: input, shape index: {}]   ;;  %s3986_s2 = inlined_call_operand.hbm [shape: f32[2,1,8], index: 2, kind: input, shape index: {}]   ;;  %s3987_s3 = inlined_call_operand.hbm [shape: f32[2,1,16], index: 3, kind: input, shape index: {}]   ;;  %s3988_s4 = inlined_call_operand.vmem [shape: bf16[64,32], index: 4, kind: input, shape index: {}]   ;;  %s3989_s5 = inlined_call_operand.hbm [shape: f32[1,32], index: 5, kind: input, shape index: {}]   ;;  %s3990_s6 = inlined_call_operand.vmem [shape: bf16[2,32,96], index: 6, kind: input, shape index: {}]   ;;  %s3991_s7 = inlined_call_operand.hbm [shape: f32[2,1,96], index: 7, kind: input, shape index: {}]   ;;  %s3992_s8 = inlined_call_operand.vmem [shape: bf16[2,32,32], index: 8, kind: input, shape index: {}]   ;;  %s3993_s9 = inlined_call_operand.hbm [shape: f32[2,1,32], index: 9, kind: input, shape index: {}]   ;;  %s3994_s10 = inlined_call_operand.vmem [shape: bf16[2,32,32], index: 10, kind: input, shape index: {}]   ;;  %s3995_s11 = inlined_call_operand.hbm [shape: f32[2,1,32], index: 11, kind: input, shape index: {}]   ;;  %s3996_s12 = inlined_call_operand.vmem [shape: bf16[2,32,64], index: 12, kind: input, shape index: {}]   ;;  %s3997_s13 = inlined_call_operand.hbm [shape: f32[2,1,64], index: 13, kind: input, shape index: {}]   ;;  %s3998_s14 = inlined_call_operand.vmem [shape: bf16[2,32,32], index: 14, kind: input, shape index: {}]   ;;  %s3999_s15 = inlined_call_operand.hbm [shape: f32[2,1,32], index: 15, kind: input, shape index: {}]   ;;  %s4000_s16 = inlined_call_operand.hbm [shape: f32[2,3,1,32], index: 16, kind: input, shape index: {}]   ;;  %s4001_s17 = inlined_call_operand.hbm [shape: f32[2,3,1,32], index: 17, kind: input, shape index: {}]   ;;  %s4002_s18 = inlined_call_operand.vmem [shape: bf16[2,32,128], index: 18, kind: input, shape index: {}]   ;;  %s4003_s19 = inlined_call_operand.hbm [shape: f32[2,1,128], index: 19, kind: input, shape index: {}]   ;;  %s4004_s20 = inlined_call_operand.vmem [shape: bf16[2,128,32], index: 20, kind: input, shape index: {}]   ;;  %s4005_s21 = inlined_call_operand.vmem [shape: f32[2,1,32], index: 21, kind: input, shape index: {}]   ;;  %s4006_s22 = inlined_call_operand.vmem [shape: f32[2,1,32], index: 22, kind: input, shape index: {}]   ;;  %s4007_s23 = inlined_call_operand.hbm [shape: f32[2,8,32], index: 23, kind: output, shape index: {}]  }
   0x1   :  { %4046 = sst [smem:[#allocation56_spill]] %s3984_s0 }
   0x2   :  { %4047 = sst [smem:[#allocation57_spill]] %s3985_s1 }
   0x3   :  { %4048 = sst [smem:[#allocation58_spill]] %s3986_s2 }
   0x4   :  { %4049 = sst [smem:[#allocation59_spill]] %s3987_s3 }
   0x5   :  { %4050 = sst [smem:[#allocation60_spill]] %s3988_s4 }
   0x6   :  { %4051 = sst [smem:[#allocation61_spill]] %s3989_s5 }
   0x7   :  { %4052 = sst [smem:[#allocation62_spill]] %s3990_s6 }
   0x8   :  { %4053 = sst [smem:[#allocation63_spill]] %s3991_s7 }
   0x9   :  { %4054 = sst [smem:[#allocation64_spill]] %s3992_s8 }
   0xa   :  { %4055 = sst [smem:[#allocation65_spill]] %s3993_s9 }
   0xb   :  { %4056 = sst [smem:[#allocation66_spill]] %s3994_s10 }
   0xc   :  { %4057 = sst [smem:[#allocation67_spill]] %s3995_s11 }
   0xd   :  { %4058 = sst [smem:[#allocation68_spill]] %s3996_s12 }
   0xe   :  { %4059 = sst [smem:[#allocation69_spill]] %s3997_s13 }
   0xf   :  { %4060 = sst [smem:[#allocation70_spill]] %s3998_s14 }
  0x10   :  { %4061 = sst [smem:[#allocation71_spill]] %s3999_s15 }
  0x11   :  { %4062 = sst [smem:[#allocation72_spill]] %s4000_s16 }
  0x12   :  { %4063 = sst [smem:[#allocation73_spill]] %s4001_s17 }
  0x13   :  { %4064 = sst [smem:[#allocation74_spill]] %s4002_s18 }
  0x14   :  { %4065 = sst [smem:[#allocation75_spill]] %s4003_s19 }
  0x15   :  { %4066 = sst [smem:[#allocation76_spill]] %s4004_s20 }
  0x16   :  { %4067 = sst [smem:[#allocation77_spill]] %s4005_s21 }
  0x17   :  { %4068 = sst [smem:[#allocation78_spill]] %s4006_s22 }
  0x18   :  { %4069 = sst [smem:[#allocation79_spill]] %s4007_s23 }
  0x19   :  { %28 = vsyncpa [#allocation6], 0 }
  0x1a   :  { %30 = vsyncpa [#allocation6 + $0x1], 0 }
  0x1b   :  { %31 = vsyncpa [#allocation9], 0 }
  0x1c   :  { %33 = vsyncpa [#allocation9 + $0x1], 0 }
  0x1d   :  { %34 = vsyncpa [#allocation12], 0 }
  0x1e   :  { %36 = vsyncpa [#allocation12 + $0x1], 0 }
  0x1f   :  { %37 = vsyncpa [#allocation15], 0 }
  0x20   :  { %39 = vsyncpa [#allocation15 + $0x1], 0 }
  0x21   :  { %40 = vsyncpa [#allocation18], 0 }
  0x22   :  { %42 = vsyncpa [#allocation18 + $0x1], 0 }
  0x23   :  { %43 = vsyncpa [#allocation21], 0 }
  0x24   :  { %45 = vsyncpa [#allocation21 + $0x1], 0 }
  0x25   :  { %46 = vsyncpa [#allocation24], 0 }
  0x26   :  { %48 = vsyncpa [#allocation24 + $0x1], 0 }
  0x27   :  { %49 = vsyncpa [#allocation7], 0 }
  0x28   :  { %51 = vsyncpa [#allocation7 + $0x1], 0  ;;  %s3414_s4 = smov 0   ;;  %s3416_s30 = smov 0  }
  0x29   :  { %s3418_s24 = smov 0   ;;  %s3420_s25 = smov 0  }
  0x2a   :  { %s3422_s5 = smov 0   ;;  %s3424_s1 = smov 0  }
  0x2b   :  { %s3426_s26 = smov 0   ;;  %s3428_s2 = smov 0  }
  0x2c   :  { %s3430_s6 = smov 0   ;;  %s3432_s27 = smov 0  }
  0x2d   :  { %s3434_s7 = smov 0  }
  0x2e LB: > { %4070 = sst [smem:[#allocation36_spill]] %s3247_s30  ;;  %s3470_s28 = sadd.s32 4294967295, %s3283_s7   ;;  %s3283_s7 = sphi %s3434_s7, %s57_s7   ;;  %s3279_s27 = sphi %s3432_s27, %s4165_s27   ;;  %s3275_s6 = sphi %s3430_s6, %s4164_s6   ;;  %s3271_s2 = sphi %s3428_s2, %s4163_s2   ;;  %s3267_s26 = sphi %s3426_s26, %s4162_s26   ;;  %s3263_s1 = sphi %s3424_s1, %s4161_s1   ;;  %s3259_s5 = sphi %s3422_s5, %s4160_s5   ;;  %s3255_s25 = sphi %s3420_s25, %s4159_s25   ;;  %s3251_s24 = sphi %s3418_s24, %s4158_s24   ;;  %s3247_s30 = sphi %s3416_s30, %s4157_s30   ;;  %s3243_s4 = sphi %s3414_s4, %s4156_s4  }
  0x2f   : > { %4071 = sst [smem:[#allocation37_spill]] %s3251_s24  ;;  %s2405_s29 = sadd.s32 4294967294, %s3283_s7  }
  0x30   : > { %4072 = sst [smem:[#allocation38_spill]] %s3255_s25  ;;  %s66_s3 = sadd.s32 1, %s3275_s6 }
  0x31   : > { %4073 = sst [smem:[#allocation39_spill]] %s3259_s5  ;;  %s69_s0 = sadd.s32 1, %s3279_s27 }
  0x32   : > { %4074 = sst [smem:[#allocation40_spill]] %s3263_s1  ;;  %p67_p0 = scmp.ge.s32.totalorder %s66_s3, 2 }
  0x33   : > { %4075 = sst [smem:[#allocation41_spill]] %s3267_s26  ;;  %s76_s23 = sadd.s32 1, %s3263_s1 }
  0x34   : > { %4076 = sst [smem:[#allocation42_spill]] %s3271_s2  ;;  %p4013_p1 = scmp.ne.s32.totalorder %s3263_s1, %s3259_s5 }
  0x35   : > { %4077 = sst [smem:[#allocation43_spill]] %s3275_s6  ;;  %p84_p2 = scmp.eq.s32.totalorder %s3283_s7, 0 }
  0x36   : > { %4078 = sst [smem:[#allocation44_spill]] %s3279_s27  ;;  %s4167_s3 = smov (%p67_p0, %s66_s3), 0 }
  0x37   : > { %4079 = sst [smem:[#allocation45_spill]] %s3283_s7  ;;  %s4169_s0 = smov (!%p67_p0, %s69_s0), %s3279_s27 }
  0x38   : > { %4080 = sst [smem:[#allocation46_spill]] %s3470_s28  ;;  %p3487_p3 = por %p84_p2, %p4013_p1 }
  0x39   : > { %4081 = sst [smem:[#allocation47_spill]] %s4167_s3  ;;  %p4012_p4 = scmp.ne.s32.totalorder %s3259_s5, %s3255_s25 }
  0x3a   : > { %s4082_s2 = scalar_select %p3487_p3, 1, 0 }
  0x3b   : > { %p71_p5 = scmp.ge.s32.totalorder %s4169_s0, 2  ;;  %p90_p6 = scmp.eq.s32.totalorder %s3470_s28, 0 }
  0x3c   : > { %s245_s22 = ssub.s32 %s3275_s6, %s4167_s3  ;;  %s248_s21 = sadd.s32 1, %s3251_s24 }
  0x3d   : > { %s4171_s0 = smov (%p71_p5, %s4169_s0), 0  ;;  %p3504_p7 = por %p90_p6, %p4012_p4 }
  0x3e   : > { %4083 = sst [smem:[#allocation48_spill]] %s4171_s0  ;;  %p246_p8 = scmp.eq.s32.totalorder %s245_s22, 0 }
  0x3f   : > { %s4084_s20 = scalar_select %p3504_p7, 1, 0 }
  0x40   : > { %s73_s18 = ssub.s32 %s3279_s27, %s4171_s0  ;;  %p255_p9 = scmp.ne.s32.totalorder %s3251_s24, %s3247_s30 }
  0x41   : > { %p74_p10 = scmp.eq.s32.totalorder %s73_s18, 0  ;;  %p261_p11 = scmp.ne.s32.totalorder %s3247_s30, %s3243_s4 }
  0x42   : > { %s3515_s3 = scalar_select %p246_p8, %s3251_s24, %s248_s21  }
  0x43   : > { %s3518_s14 = scalar_select %p74_p10, %s3263_s1, %s76_s23  }
  0x44   : > { %4085 = sst [smem:[#allocation49_spill]] %s3515_s3  ;;  %p3522_p12 = por %p255_p9, %p84_p2 }
  0x45   : > { %4086 = sst [smem:[#allocation50_spill]] %s3518_s14  ;;  %p3528_p13 = por %p261_p11, %p90_p6 }
  0x46   : > { %p670_p0 = scmp.eq.s32.totalorder %s3470_s28, 3  ;;  %p676_p5 = scmp.eq.s32.totalorder %s2405_s29, 3 }
  0x47   : > { %s4088_s10 = scalar_select %p3528_p13, 1, 0 }
  0x48   : > { %p2406_p4 = scmp.ge.s32.totalorder %s3283_s7, 1  ;;  %p683_p1 = scmp.lt.s32.totalorder %s3283_s7, 5 }
  0x49   : > { %4089 = sst [smem:[#allocation51_spill]] %s4088_s10  ;;  %p4090_p7 = scmp.ne.s32.totalorder %s3263_s1, %s3259_s5 }
  0x4a   : > { %p4093_p10 = scmp.ne.s32.totalorder %s3259_s5, %s3255_s25  ;;  %p3549_p2 = pnand %p2406_p4, %p683_p1 }
  0x4b   : > { %p3538_p8 = por %p670_p0, %p4090_p7  ;;  %s4097_s0 = sld [smem:[#allocation61_spill]] }
  0x4c   : > { %p3545_p3 = por %p676_p5, %p4093_p10  ;;  %p2623_p9 = pneg %p3549_p2 }
  0x4d   : > { %s4091_s18 = scalar_select %p3538_p8, 1, 0 }
  0x4e   : > { %s4094_s21 = scalar_select %p3545_p3, 1, 0 }
  0x4f   : > { %4092 = sst [smem:[#allocation52_spill]] %s4091_s18  ;;  %s3285_s14 = smov [#allocation13]  }
  0x50   : > { %4095 = sst [smem:[#allocation53_spill]] %s4094_s21  ;;  %s700_s3 = sshll.u32 %s3285_s14, 4  ;;  %s701_s3 = int_to_ptr.vmem [resolvable:$true] %s700_s3 }
  0x51   : > { %s698_s29 = sshll.u32 %s4097_s0, 4  ;;  %p2624_p7 = pnand %p2623_p9, %p90_p6  ;;  %s699_s29 = int_to_ptr.hbm [resolvable:$true] %s698_s29 }
  0x52   : > { %p2408_p11 = scmp.ge.s32.totalorder %s3283_s7, 4 }
  0x53   : > { %2626 = dma.hbm_to_vmem [thread:$0]  (!%p2624_p7), %s699_s29, 16, %s701_s3, [#allocation12]  }
  0x54   : > { %710 = sbr.rel (%p2408_p11) target bundleno = 146 (0x92), region = 28  ;;  %s3562_s23 = sand.u32 (!%p2408_p11), 1, %s3263_s1  }
  0x55   : > { %s3565_s0 = sand.u32 (!%p2408_p11), 1, %s3283_s7   ;;  %s2411_s14 = sshll.u32 (!%p2408_p11), %s3562_s23, 3 }
  0x56   : > { %s2555_s4 = sshll.u32 (!%p2408_p11), %s3279_s27, 3  ;;  %s4098_s29 = sld [smem:[#allocation57_spill]] (!%p2408_p11) }
  0x57   : > { %s737_s18 = scalar_lea.vmem (!%p2408_p11), [#allocation8], %s2411_s14  ;;  %s4032_s1 = scalar_lea.sflag (!%p2408_p11), [#allocation9], %s3565_s0 }
  0x58   : > { %s745_s8 = sshll.u32 (!%p2408_p11), %s737_s18, 4  ;;  %s3286_s7 = smov (!%p2408_p11), 64   ;;  %s746_s8 = int_to_ptr.vmem [resolvable:$true] %s745_s8 }
  0x59   : > { %s3287_s10 = smov 4   ;;  %p4099_p1 = scmp.ne.s32.totalorder %s4082_s2, 0 }
  0x5a   : > { %s3578_s30 = sand.u32 1, %s3251_s24   ;;  %s4100_s14 = sld [smem:[#allocation63_spill]] }
  0x5b   : > { %s800_s3 = scalar_lea.vmem [#allocation14], %s3578_s30  ;;  %s4031_s28 = scalar_lea.sflag [#allocation15], %s3565_s0 }
  0x5c   : > { %s742_s25 = scalar_lea.hbm %s4098_s29, %s2555_s4  ;;  %s807_s29 = sshll.u32 %s800_s3, 4  ;;  %s808_s29 = int_to_ptr.vmem [resolvable:$true] %s807_s29 }
  0x5d   : > { %s743_s26 = sshll.u32 %s742_s25, 4  ;;  %s4101_s11 = sld [smem:[#allocation67_spill]]  ;;  %s744_s26 = int_to_ptr.hbm [resolvable:$true] %s743_s26 }
  0x5e   : > { %2596 = dma.hbm_to_vmem [thread:$0]  (%p4099_p1), %s744_s26, 128, %s746_s8, %s4032_s1, %s3286_s7, %s3286_s7, %s3287_s10  }
  0x5f   : > { %s850_s21 = scalar_lea.vmem [#allocation17], %s3578_s30  ;;  %s4102_s15 = sld [smem:[#allocation71_spill]] }
  0x60   : > { %s803_s25 = scalar_lea.hbm %s4100_s14, %s3275_s6  ;;  %s857_s4 = sshll.u32 %s850_s21, 4  ;;  %s858_s4 = int_to_ptr.vmem [resolvable:$true] %s857_s4 }
  0x61   : > { %s805_s18 = sshll.u32 %s803_s25, 4  ;;  %s4030_s14 = scalar_lea.sflag [#allocation18], %s3565_s0  ;;  %s806_s18 = int_to_ptr.hbm [resolvable:$true] %s805_s18 }
  0x62   : > { %2599 = dma.hbm_to_vmem [thread:$0]  (%p3522_p12), %s806_s18, 16, %s808_s29, %s4031_s28  }
  0x63   : > { %s853_s26 = scalar_lea.hbm %s4101_s11, %s3275_s6  ;;  %s900_s29 = scalar_lea.vmem [#allocation20], %s3578_s30 }
  0x64   : > { %s855_s7 = sshll.u32 %s853_s26, 4  ;;  %s907_s8 = sshll.u32 %s900_s29, 4  ;;  %s856_s7 = int_to_ptr.hbm [resolvable:$true] %s855_s7  ;;  %s908_s8 = int_to_ptr.vmem [resolvable:$true] %s907_s8 }
  0x65   : > { %2601 = dma.hbm_to_vmem [thread:$0]  (%p3522_p12), %s856_s7, 16, %s858_s4, %s4030_s14  }
  0x66   : > { %s903_s3 = scalar_lea.hbm %s4102_s15, %s3275_s6  ;;  %s4034_s26 = smul.u32 3, %s3578_s30 }
  0x67   : > { %s905_s10 = sshll.u32 %s903_s3, 4  ;;  %s4033_s21 = scalar_lea.sflag [#allocation21], %s3565_s0  ;;  %s906_s10 = int_to_ptr.hbm [resolvable:$true] %s905_s10 }
  0x68   : > { %2603 = dma.hbm_to_vmem [thread:$0]  (%p3522_p12), %s906_s10, 16, %s908_s8, %s4033_s21  }
  0x69   : > { %s4035_s7 = smul.u32 3, %s3275_s6  ;;  %s4103_s17 = sld [smem:[#allocation73_spill]] }
  0x6a   : > { %s939_s3 = scalar_lea.vmem [#allocation23], %s4034_s26  ;;  %s4036_s28 = scalar_lea.sflag [#allocation24], %s3565_s0 }
  0x6b   : > { %s946_s29 = sshll.u32 %s939_s3, 4  ;;  %s4037_s1 = smov 16   ;;  %s947_s29 = int_to_ptr.vmem [resolvable:$true] %s946_s29 }
  0x6c   : > { %s4038_s11 = smov 1   ;;  %s2409_s8 = sshll.u32 %s3562_s23, 2 }
  0x6d   : > { %s2410_s10 = sshll.u32 %s3279_s27, 2  ;;  %s718_s21 = scalar_lea.vmem [#allocation5], %s2409_s8 }
  0x6e   : > { %s726_s26 = sshll.u32 %s718_s21, 4  ;;  %s715_s15 = scalar_lea.sflag [#allocation6], %s3562_s23  ;;  %s727_s26 = int_to_ptr.vmem [resolvable:$true] %s726_s26 }
  0x6f   : > { %s943_s18 = scalar_lea.hbm %s4103_s17, %s4035_s7  ;;  %s4106_s21 = scalar_lea.sflag [#allocation9], %s3565_s0 }
  0x70   : > { %s944_s14 = sshll.u32 %s943_s18, 4  ;;  %s4104_s18 = sld [smem:[#allocation56_spill]]  ;;  %s945_s14 = int_to_ptr.hbm [resolvable:$true] %s944_s14 }
  0x71   : > { %2605 = dma.hbm_to_vmem [thread:$0]  (%p3522_p12), %s945_s14, 48, %s947_s29, %s4036_s28, %s4037_s1, %s4037_s1, %s4038_s11  }
  0x72   : > { %s4105_s28 = sld [smem:[#allocation58_spill]]  ;;  %s758_s11 = scalar_lea.vmem [#allocation10], %s3562_s23 }
  0x73   : > { %s765_s4 = sshll.u32 %s758_s11, 4  ;;  %s773_s11 = scalar_lea.sflag [#allocation12], %s3565_s0  ;;  %s766_s4 = int_to_ptr.vmem [resolvable:$true] %s765_s4 }
  0x74   : > { %s4108_s9 = sld [smem:[#allocation65_spill]] }
  0x75   : > { %s4110_s13 = sld [smem:[#allocation69_spill]] }
  0x76   : > { %s722_s3 = scalar_lea.hbm %s4104_s18, %s2410_s10  ;;  %s4107_s18 = sld [smem:[#allocation59_spill]] }
  0x77   : > { %s724_s7 = sshll.u32 %s722_s3, 4  ;;  %s4113_s16 = sld [smem:[#allocation72_spill]]  ;;  %s725_s7 = int_to_ptr.hbm [resolvable:$true] %s724_s7 }
  0x78   : > { %2595 = dma.hbm_to_vmem [thread:$0]  (%p4099_p1), %s725_s7, 64, %s727_s26, %s715_s15  }
  0x79   : > { %s761_s1 = scalar_lea.hbm %s4105_s28, %s3279_s27  ;;  %s775_s7 = scalar_lea.vmem [#allocation11], %s3562_s23 }
  0x7a   : > { %s763_s10 = sshll.u32 %s761_s1, 4  ;;  %s782_s28 = sshll.u32 %s775_s7, 4  ;;  %s764_s10 = int_to_ptr.hbm [resolvable:$true] %s763_s10  ;;  %s783_s28 = int_to_ptr.vmem [resolvable:$true] %s782_s28 }
  0x7b   : > { %2597 = dma.hbm_to_vmem [thread:$0]  (%p4099_p1), %s764_s10, 16, %s766_s4, %s4106_s21  }
  0x7c   : > { %s778_s15 = scalar_lea.hbm %s4107_s18, %s3279_s27  ;;  %s828_s14 = scalar_lea.hbm %s4108_s9, %s3275_s6 }
  0x7d   : > { %s780_s26 = sshll.u32 %s778_s15, 4  ;;  %s830_s29 = sshll.u32 %s828_s14, 4  ;;  %s781_s26 = int_to_ptr.hbm [resolvable:$true] %s780_s26  ;;  %s831_s29 = int_to_ptr.hbm [resolvable:$true] %s830_s29 }
  0x7e   : > { %2598 = dma.hbm_to_vmem [thread:$0]  (%p4099_p1), %s781_s26, 16, %s783_s28, %s773_s11  }
  0x7f   : > { %s825_s4 = scalar_lea.vmem [#allocation16], %s3578_s30  ;;  %s4109_s23 = scalar_lea.sflag [#allocation15], %s3565_s0 }
  0x80   : > { %s832_s10 = sshll.u32 %s825_s4, 4  ;;  %s878_s8 = scalar_lea.hbm %s4110_s13, %s3275_s6  ;;  %s833_s10 = int_to_ptr.vmem [resolvable:$true] %s832_s10 }
  0x81   : > { %2600 = dma.hbm_to_vmem [thread:$0]  (%p3522_p12), %s831_s29, 16, %s833_s10, %s4109_s23  }
  0x82   : > { %s880_s25 = sshll.u32 %s878_s8, 4  ;;  %s875_s18 = scalar_lea.vmem [#allocation19], %s3578_s30  ;;  %s881_s25 = int_to_ptr.hbm [resolvable:$true] %s880_s25 }
  0x83   : > { %s882_s15 = sshll.u32 %s875_s18, 4  ;;  %s4111_s26 = scalar_lea.sflag [#allocation18], %s3565_s0  ;;  %s883_s15 = int_to_ptr.vmem [resolvable:$true] %s882_s15 }
  0x84   : > { %2602 = dma.hbm_to_vmem [thread:$0]  (%p3522_p12), %s881_s25, 16, %s883_s15, %s4111_s26  }
  0x85   : > { %s4112_s7 = smul.u32 3, %s3275_s6  ;;  %s4115_s10 = smov 1  }
  0x86   : > { %s4114_s14 = smul.u32 3, %s3578_s30  ;;  %s4116_s23 = smov 16  }
  0x87   : > { %s922_s1 = scalar_lea.hbm %s4113_s16, %s4112_s7  ;;  %s4117_s21 = scalar_lea.sflag [#allocation21], %s3565_s0 }
  0x88   : > { %s923_s3 = sshll.u32 %s922_s1, 4  ;;  %s918_s29 = scalar_lea.vmem [#allocation22], %s4114_s14  ;;  %s924_s3 = int_to_ptr.hbm [resolvable:$true] %s923_s3 }
  0x89   : > { %s925_s4 = sshll.u32 %s918_s29, 4  ;;  %s4118_s19 = sld [smem:[#allocation75_spill]]  ;;  %s926_s4 = int_to_ptr.vmem [resolvable:$true] %s925_s4 }
  0x8a   : > { %2604 = dma.hbm_to_vmem [thread:$0]  (%p3522_p12), %s924_s3, 48, %s926_s4, %s4117_s21, %s4116_s23, %s4116_s23, %s4115_s10  }
  0x8b   : > { %s967_s15 = scalar_lea.vmem [#allocation25], %s3578_s30  ;;  %s4119_s7 = scalar_lea.sflag [#allocation24], %s3565_s0 }
  0x8c   : > { %s974_s26 = sshll.u32 %s967_s15, 4  ;;  %s975_s26 = int_to_ptr.vmem [resolvable:$true] %s974_s26 }
  0x8f   : > { %s970_s25 = scalar_lea.hbm %s4118_s19, %s3275_s6 }
  0x90   : > { %s972_s18 = sshll.u32 %s970_s25, 4  ;;  %s973_s18 = int_to_ptr.hbm [resolvable:$true] %s972_s18 }
  0x91   : > { %2606 = dma.hbm_to_vmem [thread:$0]  (%p3522_p12), %s973_s18, 16, %s975_s26, %s4119_s7  }
  0x92 PF: > { %997 = sbr.rel (%p3549_p2) target bundleno = 3480 (0xd98), region = 112 }
  0x97   : > { %s3696_s28 = sand.u32 1, %s3259_s5   ;;  %p4120_p4 = scmp.ne.s32.totalorder %s4084_s20, 0 }
  0x98   : > { %s2415_s11 = sshll.u32 %s3696_s28, 2  ;;  %s1000_s1 = scalar_lea.sflag [#allocation6], %s3696_s28 }
  0x99   : > { %s3700_s3 = scalar_lea.vmem [#allocation5], %s2415_s11 }
  0x9a   : > { %3206 = dma.done.wait (%p4120_p4), %s1000_s1, 64  }
  0x9b   : > { %3208 = vsyncadd (%p4120_p4), %s1000_s1, 4294967232  ;;  %s4121_s12 = sld [smem:[#allocation46_spill]]  ;;  %s4039_s22 = sshll.u32 %s3696_s28, 3 }
  0x9c   : > { %s3713_s14 = scalar_lea.vmem [#allocation8], %s4039_s22 }
  0xa1   : > { %s3707_s30 = sand.u32 1, %s4121_s12  }
  0xa2   : > { %s1010_s0 = scalar_lea.sflag [#allocation9], %s3707_s30 }
  0xa3   : > { %3210 = dma.done.wait (%p4120_p4), %s1010_s0, 144  }
  0xa4   : > { %3212 = vsyncadd (%p4120_p4), %s1010_s0, 4294967152  ;;  %s1029_s4 = scalar_lea.sflag [#allocation12], %s3707_s30 }
  0xa5   : > { %3214 = dma.done.wait (%p4120_p4), %s1029_s4, 16  }
  0xa6   : > { %3216 = vsyncadd (%p4120_p4), %s1029_s4, 4294967280 }
  0xa7   : > { %3218 = dma.done.wait (%p90_p6), [#allocation12], 16  }
  0xa8   : > { %3220 = vsyncadd (%p90_p6), [#allocation12], 4294967280  ;;  %s4122_s23 = sld [smem:[#allocation36_spill]]  ;;  %s1043_s8 = scalar_lea.sflag [#allocation15], %s3707_s30 }
  0xae   : > { %s3731_s2 = sand.u32 1, %s4122_s23  }
  0xaf   : > { %3222 = dma.done.wait (%p3528_p13), %s1043_s8, 32  }
  0xb0   : > { %3224 = vsyncadd (%p3528_p13), %s1043_s8, 4294967264  ;;  %s1061_s18 = scalar_lea.sflag [#allocation18], %s3707_s30 }
  0xb1   : > { %3226 = dma.done.wait (%p3528_p13), %s1061_s18, 32  }
  0xb2   : > { %3228 = vsyncadd (%p3528_p13), %s1061_s18, 4294967264  ;;  %s1079_s7 = scalar_lea.sflag [#allocation21], %s3707_s30 }
  0xb3   : > { %3230 = dma.done.wait (%p3528_p13), %s1079_s7, 64  }
  0xb4   : > { %3232 = vsyncadd (%p3528_p13), %s1079_s7, 4294967232  ;;  %s2592_s1 = smul.u32 3, %s3731_s2  ;;  %s1098_s0 = scalar_lea.sflag [#allocation24], %s3707_s30 }
  0xb6   : > { %s3754_s12 = scalar_lea.vmem [#allocation22], %s2592_s1  ;;  %s3757_s4 = scalar_lea.vmem [#allocation23], %s2592_s1 }
  0xb7   : > { %4124 = sst [smem:[#allocation54_spill]] %s3754_s12 }
  0xb8   : > { %4125 = sst [smem:[#allocation55_spill]] %s3757_s4 }
  0xb9   : > { %3234 = dma.done.wait (%p3528_p13), %s1098_s0, 64  }
  0xba   : > { %3236 = vsyncadd (%p3528_p13), %s1098_s0, 4294967232  ;;  %s4126_s23 = sld [smem:[#allocation41_spill]]  ;;  %s4135_s4 = sshll.u32 %s3696_s28, 3 }
  0xbb   : > { %s4127_s11 = sld [smem:[#allocation62_spill]]  ;;  %s3811_s12 = scalar_lea.vmem [#allocation26], %s4135_s4 }
  0xbc   : > { %s4128_s0 = sld [smem:[#allocation64_spill]] }
  0xbd   : > { %s4129_s29 = sld [smem:[#allocation66_spill]] }
  0xbe   : > { %s4130_s16 = sld [smem:[#allocation68_spill]] }
  0xbf   : > { %s4131_s30 = sld [smem:[#allocation70_spill]] }
  0xc0   : > { %p1259_p6 = scmp.lt.s32.totalorder %s4126_s23, 1  ;;  %s4132_s26 = sld [smem:[#allocation74_spill]] }
  0xc1   : > { %s4133_s10 = sld [smem:[#allocation76_spill]]  ;;  %p2433_p12 = scmp.ne.s32.totalorder %s4126_s23, 0 }
  0xc2   : > { %s3765_s8 = scalar_select %p1259_p6, %s4126_s23, 1 }
  0xc3   : > { %s4134_s9 = sld [smem:[#allocation77_spill]]  ;;  %s4136_s19 = scalar_lea.vmem (!%p2433_p12), [#allocation10], %s3696_s28 }
  0xc4   : > { %s2556_s18 = sshll.u32 %s3765_s8, 4  ;;  %s2562_s7 = sshll.u32 %s3765_s8, 6 }
  0xc5   : > { %s3772_s15 = scalar_lea.vmem %s4127_s11, %s2556_s18  ;;  %s3777_s20 = scalar_lea.vmem %s4128_s0, %s2556_s18 }
  0xc6   : > { %s3782_s22 = scalar_lea.vmem %s4129_s29, %s2556_s18  ;;  %s3787_s17 = scalar_lea.vmem %s4130_s16, %s2556_s18 }
  0xc7   : > { %s3792_s11 = scalar_lea.vmem %s4131_s30, %s2556_s18  ;;  %s3797_s21 = scalar_lea.vmem %s4132_s26, %s2556_s18 }
  0xc8   : > { %s3802_s29 = scalar_lea.vmem %s4133_s10, %s2562_s7  ;;  %s1110_s16 = scalar_lea.vmem [#allocation25], %s3731_s2 }
  0xc9   : > { %s1296_s13 = scalar_lea.vmem %s4134_s9, %s3765_s8  ;;  %1301 = sbr.rel (%p2433_p12) target bundleno = 358 (0x166), region = 168 }
  0xca   : > { %s4137_s5 = scalar_lea.vmem (!%p2433_p12), [#allocation11], %s3696_s28  ;;  %s4138_s18 = sld [smem:[#allocation60_spill]] (!%p2433_p12) }
  0xce   : > { %v1302_v0 = vlaneseq  ;;  %v1308_v1 = vld [vmem:[%s4136_s19] sm:$0x1]  ;;  %v3290_v6 = vmov -1e+30   ;;  %vm1323_vm2 = vcmask 130048   ;;  %vm1315_vm4 = vcmask 64512  }
  0xcf   : > { %vm1309_vm0 = vcmp.gt.f32.partialorder %v1308_v1, 0.5  ;;  %v1317_v2 = vld [vmem:[%s4137_s5] sm:$0x1]  ;;  %v1325_v16 = vld [vmem:[%s3700_s3] sm:$0xf]  ;;  %vm1362_vm5 = vcmask 523264  }
  0xd0   : > { %v2566_v3 = vld [vmem:[%s4138_s18 + $0x18] sm:$0xff]  ;;  %v1303_v4 = vshrl.u32 %v1302_v0, 7  ;;  %v1305_v5 = vand.u32 127, %v1302_v0  ;;  %v1310_v7 = vsel %vm1309_vm0, 0.0, %v3290_v6  ;;  %vm1318_vm1 = vcmp.gt.f32.partialorder %v1317_v2, 0.5  ;;  %v2565_v10 = vld [vmem:[%s4138_s18 + $0x10] sm:$0xff] }
  0xd1   : > { %v1312_v8 = vperm.slane %v1310_v7, 0  ;;  %v1319_v9 = vsel %vm1318_vm1, 0.0, %v3290_v6  ;;  %1370 = vmatpush.bf16.msra.mxu0 %v2566_v3  ;;  %v2564_v14 = vld [vmem:[%s4138_s18 + $0x8] sm:$0xff]  ;;  %v2563_v15 = vld [vmem:[%s4138_s18] sm:$0xff]  ;;  %v2731_v17 = vld [vmem:[#allocation13] ss:$0 sm:$0xff] }
  0xd2   : > { %vm1306_vm3 = vcmp.le.s32.totalorder %v1305_v5, %v1303_v4  ;;  %v1321_v11 = vperm.slane %v1319_v9, 0  ;;  %vm1379_vm6 = vcmask 261120  }
  0xd3   : > { %v1307_v12 = vsel %vm1306_vm3, 0.0, %v3290_v6 }
  0xd4   : > { %v1314_v13 = vadd.f32 %v1312_v8, %v1307_v12  ;;  %1324 = vst.msk [vmem:[#allocation4] sm:$0xff] %vm1323_vm2, %v1321_v11 }
  0xd5   : > { %1371 = vmatpush.bf16.msra.mxu0 %v2565_v10 }
  0xd6   : > { %1316 = vst.msk [vmem:[#allocation3] sm:$0xff] %vm1315_vm4, %v1314_v13 }
  0xd9   : > { %1372 = vmatpush.bf16.msra.mxu0 %v2564_v14 }
  0xdd   : > { %1373 = vmatpush.bf16.msra.mxu0 %v2563_v15 }
  0xe0   : > { %2450 = vmatmul.msk.bf16.vlgmr.msra.gmra.mxu0 %vm1362_vm5, %v1325_v16 }
 0x15d   : > { %v1375_v18 = vpop.f32.mrf.mxu0 }
 0x15e   : > { %v1376_v19 = vadd.f32 %v2731_v17, %v1375_v18 }
 0x160   : > { %1380 = vst.msk [vmem:[#allocation2] sm:$0xff] %vm1379_vm6, %v1376_v19 }
 0x165   : > { %v1377_v20 = vpop.f32.mrf.mxu0 }
 0x166 PF: > { %v2568_v21 = vld [vmem:[%s3772_s15 + $0x8] sm:$0xff]  ;;  %v2567_v22 = vld [vmem:[%s3772_s15] sm:$0xff]  ;;  %vm1403_vm7 = vcmask 261120   ;;  %s4139_s3 = scalar_lea.vmem [#allocation14], %s3731_s2  ;;  %s3291_s26 = smov 96   ;;  %vm1446_vm8 = vcmask 64512  }
 0x167   : > { %v3833_v23 = vld [vmem:[#allocation2] sm:$0xff]  ;;  %1413 = vmatpush.bf16.msra.mxu0 %v2568_v21  ;;  %v1420_v34 = vld [vmem:[#allocation3] sm:$0xff]  ;;  %s3292_s15 = smov 64   ;;  %vm1477_vm13 = vcmask 1043456   ;;  %v3293_v6 = vmov 32.0   ;;  %s4141_s0 = sld [smem:[#allocation54_spill]] }
 0x168   : > { %v1382_v24 = vpack.c.bf16 %v3833_v23, %v3833_v23  ;;  %v2732_v25 = vld [vmem:[%s4139_s3] ss:$0 sm:$0xff]  ;;  %v2570_v44 = vld [vmem:[%s3777_s20 + $0x8] sm:$0xff]  ;;  %s4142_s10 = sld [smem:[#allocation55_spill]]  ;;  %vm1680_vm2 = vcmask 130048  }
 0x169   : > { %v2569_v45 = vld [vmem:[%s3777_s20] sm:$0xff]  ;;  %s4140_s20 = scalar_lea.vmem [#allocation16], %s3731_s2  ;;  %v2575_v18 = vld [vmem:[%s3787_s17 + $0x8] sm:$0xff]  ;;  %s4147_s8 = sld [smem:[#allocation41_spill]] }
 0x16a   : > { %v2733_v0 = vld [vmem:[%s4140_s20] ss:$0 sm:$0xff]  ;;  %v2572_v21 = vld [vmem:[%s3782_s22 + $0x8] sm:$0xff] }
 0x16b   : > { %1414 = vmatpush.bf16.msra.mxu0 %v2567_v22  ;;  %v2574_v19 = vld [vmem:[%s3787_s17] sm:$0xff]  ;;  %s4143_s17 = scalar_lea.vmem [#allocation19], %s3731_s2 }
 0x16c   : > { %v2573_v20 = vld [vmem:[%s3713_s14] sm:$0xff]  ;;  %s4145_s14 = scalar_lea.vmem [#allocation20], %s3731_s2 }
 0x16d   : > { %v2571_v22 = vld [vmem:[%s3782_s22] sm:$0xff]  ;;  %s4144_s22 = scalar_lea.vmem [#allocation17], %s3731_s2 }
 0x16e   : > { %2459 = vmatmul.msk.bf16.vlgmr.msra.gmra.mxu0 %vm1403_vm7, %v1382_v24 }
 0x16f   : > { %1644 = vmatpush.bf16.msrb.mxu0 %v2575_v18  ;;  %p2549_p13 = scmp.ne.s32.totalorder %s4147_s8, 1 }
 0x170   : > { %s4148_s9 = sld [smem:[#allocation78_spill]] (!%p2549_p13) }
 0x173   : > { %1645 = vmatpush.bf16.msrb.mxu0 %v2574_v19 }
 0x17e   : > { %2492 = vmatmul.msk.bf16.vlgmr.msrb.gmra.mxu0 %vm1403_vm7, %v2573_v20 }
 0x1eb   : > { %v1416_v26 = vpop.f32.mrf.mxu0 }
 0x1ec   : > { %v1417_v27 = vadd.f32 %v2732_v25, %v1416_v26 }
 0x1ee   : > { %v1421_v28 = vpack.c.bf16 %v1417_v27, %v1417_v27 }
 0x1f0   : > { %v1423_v29 = vunpack.c.l.b16 %v1421_v28 }
 0x1f2   : > { %v1424_v30 = vpack.c.b16 %v1423_v29, %v1423_v29 }
 0x1f3   : > { %v1418_v31 = vpop.f32.mrf.mxu0 }
 0x1f4   : > { %1425 = vrot.lane.b32.xlu0 %v1424_v30, %s3291_s26 }
 0x266   : > { %v1426_v32 = vpop.permute.xlu0 %1425 }
 0x267   : > { %v1431_v33 = vsel %vm1403_vm7, %v1426_v32, 0  ;;  %v2734_v32 = vld [vmem:[%s4141_s0] ss:$0 sm:$0xff] }
 0x268   : > { %1440 = vmatpush.bf16.xpose.msra.mxu3 %v1431_v33 }
 0x26f   : > { %2460 = vmatmul.msk.bf16.vlgmr.msra.gmra.mxu3 %vm1403_vm7, %v1421_v28 }
 0x270   : > { %1524 = vmatpush.bf16.msrb.mxu3 %v2570_v44 }
 0x274   : > { %1525 = vmatpush.bf16.msrb.mxu3 %v2569_v45 }
 0x2f2   : > { %v1442_v35 = vpop.f32.mrf.mxu3 }
 0x2f3   : > { %v1443_v36 = vadd.f32 %v1442_v35, %v1420_v34  ;;  %v2735_v35 = vld [vmem:[%s4142_s10] ss:$0 sm:$0xff] }
 0x2f5   : > { %v1447_v37 = vsel %vm1446_vm8, %v1443_v36, -inf }
 0x2f6   : > { %1448 = vmax.xlane.f32.xlu0 %v1447_v37 }
 0x2fa   : > { %v1444_v38 = vpop.f32.mrf.mxu3 }
 0x369   : > { %v1449_v39 = vpop.xlane.xlu0 %1448 }
 0x36a   : > { %v1450_v40 = vsub.f32 %v1443_v36, %v1449_v39  ;;  %v2736_v39 = vld [vmem:[%s4143_s17] ss:$0 sm:$0xff] }
 0x36c   : > { %v1451_v41 = vmul.f32 1.442695, %v1450_v40  ;;  %v1647_v40 = vpop.f32.mrf.mxu0 }
 0x36e   : > { %2745 = vpow2.f32 %v1451_v41  ;;  %v1648_v41 = vadd.f32 %v2736_v39, %v1647_v40 }
 0x374   : > { %v2746_v42 = vpop.eup %2745 }
 0x375   : > { %v1453_v43 = vsel %vm1446_vm8, %v2746_v42, 0.0 }
 0x376   : > { %1454 = vadd.xlane.f32.xlu1 %v1453_v43  ;;  %v1649_v43 = vpop.f32.mrf.mxu0 }
 0x377   : > { %v1650_v44 = vadd.f32 %v2736_v39, %v1649_v43 }
 0x38f   : > { %1472 = vrot.lane.b32.xlu1 %v1424_v30, %s3292_s15 }
 0x3e9   : > { %v1455_v46 = vpop.xlane.xlu1 %1454 }
 0x3ea   : > { %2747 = vrcp.f32 %v1455_v46  ;;  %v1467_v51 = vand.u32 2147483648, %v1455_v46  ;;  %vm1461_vm10 = vweird.f32 %v1455_v46  ;;  %v1465_v53 = vand.u32 2147483647, %v1455_v46 }
 0x3eb   : > { %2749 = vrcp.f32 %v3293_v6 }
 0x3ec   : > { %v1468_v55 = vor.u32 1.1754944e-38, %v1467_v51  ;;  %vm1466_vm12 = vcmp.eq.f32.partialorder %v1465_v53, 8.507059e+37 }
 0x3f0   : > { %v2748_v47 = vpop.eup %2747 }
 0x3f1   : > { %v1457_v48 = vmul.f32 %v2748_v47, %v1455_v46  ;;  %vm1462_vm9 = vweird.f32 %v2748_v47  ;;  %v2750_v7 = vpop.eup %2749  ;;  %v1655_v46 = vpack.c.bf16 %v1650_v44, %v1650_v44 }
 0x3f2   : > { %vm1463_vm11 = vmor %vm1461_vm10, %vm1462_vm9  ;;  %v1538_v8 = vmul.f32 32.0, %v2750_v7  ;;  %vm1542_vm14 = vweird.f32 %v2750_v7 }
 0x3f3   : > { %v1458_v49 = vsub.f32 1.0, %v1457_v48 }
 0x3f4   : > { %v1539_v9 = vsub.f32 1.0, %v1538_v8 }
 0x3f5   : > { %v1459_v50 = vmul.f32 %v2748_v47, %v1458_v49 }
 0x3f6   : > { %v1540_v10 = vmul.f32 %v2750_v7, %v1539_v9 }
 0x3f7   : > { %v1460_v52 = vadd.f32 %v2748_v47, %v1459_v50  ;;  %v2737_v50 = vld [vmem:[%s4144_s22] ss:$0 sm:$0xff] }
 0x3f8   : > { %v1541_v11 = vadd.f32 %v2750_v7, %v1540_v10 }
 0x3f9   : > { %v1464_v54 = vsel %vm1463_vm11, %v2748_v47, %v1460_v52  ;;  %v1659_v47 = vunpack.c.l.b16 %v1655_v46 }
 0x3fa   : > { %v1469_v56 = vsel %vm1466_vm12, %v1468_v55, %v1464_v54  ;;  %v3853_v12 = vsel %vm1542_vm14, %v2750_v7, %v1541_v11  ;;  %v1652_v55 = vld [vmem:[#allocation4] sm:$0xff] }
 0x3fb   : > { %v1470_v57 = vmul.f32 %v2746_v42, %v1469_v56  ;;  %v1654_v42 = vpack.c.bf16 %v1648_v41, %v1648_v41 }
 0x3fd   : > { %v1471_v60 = vpack.c.bf16 %v1470_v57, %v1470_v57  ;;  %v1658_v45 = vunpack.c.l.b16 %v1654_v42 }
 0x3ff   : > { %v1660_v48 = vpack.c.b16 %v1659_v47, %v1658_v45  ;;  %v2739_v45 = vld [vmem:[%s4141_s0 + $0x1] ss:$0 sm:$0xff] }
 0x400   : > { %v2740_v47 = vld [vmem:[%s4142_s10 + $0x1] ss:$0 sm:$0xff] }
 0x401   : > { %v1473_v58 = vpop.permute.xlu1 %1472  ;;  %v1665_v49 = vsel %vm1403_vm7, %v1660_v48, 0 }
 0x402   : > { %v1479_v59 = vsel %vm1477_vm13, %v1473_v58, 0  ;;  %1674 = vmatpush.bf16.xpose.msra.mxu1 %v1665_v49 }
 0x403   : > { %1488 = vmatpush.bf16.msra.mxu2 %v1479_v59 }
 0x406   : > { %2461 = vmatmul.msk.bf16.vlgmr.msra.gmra.mxu2 %vm1446_vm8, %v1471_v60 }
 0x407   : > { %1601 = vmatpush.bf16.msrb.mxu2 %v2572_v21  ;;  %v2738_v21 = vld [vmem:[%s4145_s14] ss:$0 sm:$0xff] }
 0x40b   : > { %1602 = vmatpush.bf16.msrb.mxu2 %v2571_v22 }
 0x489   : > { %v1490_v61 = vpop.f32.mrf.mxu2 }
 0x48a   : > { %v1494_v62 = vpack.c.bf16 %v1490_v61, %v1490_v61 }
 0x48c   : > { %2470 = vmatmul.msk.bf16.vlgmr.msrb.gmra.mxu3 %vm1403_vm7, %v1494_v62 }
 0x491   : > { %v1492_v63 = vpop.f32.mrf.mxu2 }
 0x50f   : > { %v1527_v1 = vpop.f32.mrf.mxu3 }
 0x510   : > { %v1528_v2 = vadd.f32 %v2733_v0, %v1527_v1  ;;  %v2577_v1 = vld [vmem:[%s3792_s11 + $0x8] sm:$0xff] }
 0x511   : > { %1755 = vmatpush.bf16.msra.mxu2 %v2577_v1 }
 0x512   : > { %v1531_v3 = vadd.f32 %v1528_v2, %v3833_v23  ;;  %v2576_v2 = vld [vmem:[%s3792_s11] sm:$0xff] }
 0x514   : > { %v1534_v4 = vsel %vm1403_vm7, %v1531_v3, 0.0 }
 0x515   : > { %1535 = vadd.xlane.f32.xlu2 %v1534_v4  ;;  %1756 = vmatpush.bf16.msra.mxu2 %v2576_v2 }
 0x517   : > { %v1529_v5 = vpop.f32.mrf.mxu3 }
 0x588   : > { %v1536_v13 = vpop.xlane.xlu2 %1535 }
 0x589   : > { %v1544_v14 = vmul.f32 %v3853_v12, %v1536_v13 }
 0x58b   : > { %v1545_v15 = vsub.f32 %v1531_v3, %v1544_v14 }
 0x58d   : > { %v1546_v16 = vmul.f32 %v1545_v15, %v1545_v15 }
 0x58f   : > { %v1547_v17 = vsel %vm1403_vm7, %v1546_v16, 0.0 }
 0x590   : > { %1548 = vadd.xlane.f32.xlu2 %v1547_v17 }
 0x603   : > { %v1549_v23 = vpop.xlane.xlu2 %1548 }
 0x604   : > { %v1550_v24 = vmul.f32 %v1549_v23, %v3853_v12 }
 0x606   : > { %v1551_v25 = vadd.f32 1e-05, %v1550_v24 }
 0x608   : > { %2751 = vrsqrt.f32 %v1551_v25  ;;  %vm1558_vm0 = vweird.f32 %v1551_v25 }
 0x60e   : > { %v2752_v26 = vpop.eup %2751 }
 0x60f   : > { %v1553_v27 = vmul.f32 %v2752_v26, %v1551_v25  ;;  %vm1559_vm15 = vweird.f32 %v2752_v26 }
 0x610   : > { %vm1560_vm1 = vmor %vm1558_vm0, %vm1559_vm15 }
 0x611   : > { %v1554_v28 = vmul.f32 %v2752_v26, %v1553_v27 }
 0x613   : > { %v1555_v29 = vmul.f32 0.5, %v1554_v28 }
 0x615   : > { %v1556_v30 = vsub.f32 1.5, %v1555_v29 }
 0x617   : > { %v1557_v31 = vmul.f32 %v2752_v26, %v1556_v30 }
 0x619   : > { %v1561_v33 = vsel %vm1560_vm1, %v2752_v26, %v1557_v31 }
 0x61a   : > { %v1562_v34 = vmul.f32 %v1561_v33, %v1545_v15  ;;  %v2578_v33 = vld [vmem:[%s3797_s21] sm:$0xff] }
 0x61c   : > { %v1566_v36 = vmul.f32 %v2734_v32, %v1562_v34  ;;  %v2579_v32 = vld [vmem:[%s3797_s21 + $0x8] sm:$0xff]  ;;  %v2587_v34 = vld [vmem:[%s3802_s29 + $0x38] sm:$0xff] }
 0x61d   : > { %1827 = vmatpush.bf16.msra.mxu0 %v2579_v32  ;;  %1912 = vmatpush.bf16.msrb.mxu1 %v2587_v34 }
 0x61e   : > { %v3866_v37 = vadd.f32 %v2735_v35, %v1566_v36 }
 0x620   : > { %v1571_v38 = vpack.c.bf16 %v3866_v37, %v3866_v37 }
 0x621   : > { %1828 = vmatpush.bf16.msra.mxu0 %v2578_v33 }
 0x622   : > { %2479 = vmatmul.msk.bf16.vlgmr.msrb.gmra.mxu2 %vm1403_vm7, %v1571_v38 }
 0x6a5   : > { %v1604_v51 = vpop.f32.mrf.mxu2 }
 0x6a6   : > { %v1605_v52 = vadd.f32 %v2737_v50, %v1604_v51 }
 0x6a8   : > { %v1653_v53 = vpack.c.bf16 %v1605_v52, %v1605_v52  ;;  %v2585_v52 = vld [vmem:[%s3802_s29 + $0x28] sm:$0xff] }
 0x6aa   : > { %2493 = vmatmul.msk.bf16.vlgmr.msra.gmra.mxu1 %vm1403_vm7, %v1653_v53  ;;  %v2584_v53 = vld [vmem:[%s3802_s29 + $0x20] sm:$0xff] }
 0x6ad   : > { %v1606_v54 = vpop.f32.mrf.mxu2 }
 0x6ae   : > { %v2583_v54 = vld [vmem:[%s3802_s29 + $0x18] sm:$0xff] }
 0x727   : > { %v1676_v56 = vpop.f32.mrf.mxu1 }
 0x728   : > { %v1677_v57 = vadd.f32 %v1676_v56, %v1652_v55  ;;  %v2582_v55 = vld [vmem:[%s3802_s29 + $0x10] sm:$0xff]  ;;  %v2581_v56 = vld [vmem:[%s3802_s29 + $0x8] sm:$0xff] }
 0x72a   : > { %v1681_v58 = vsel %vm1680_vm2, %v1677_v57, -inf }
 0x72b   : > { %1682 = vmax.xlane.f32.xlu2 %v1681_v58  ;;  %v2741_v58 = vld [vmem:[%s1110_s16] ss:$0 sm:$0xff] }
 0x72f   : > { %v1678_v59 = vpop.f32.mrf.mxu1 }
 0x79e   : > { %v1683_v60 = vpop.xlane.xlu2 %1682 }
 0x79f   : > { %v1684_v61 = vsub.f32 %v1677_v57, %v1683_v60  ;;  %v2580_v57 = vld [vmem:[%s3802_s29] sm:$0xff] }
 0x7a1   : > { %v1685_v62 = vmul.f32 1.442695, %v1684_v61 }
 0x7a3   : > { %2753 = vpow2.f32 %v1685_v62 }
 0x7a9   : > { %v2754_v63 = vpop.eup %2753 }
 0x7aa   : > { %v1687_v0 = vsel %vm1680_vm2, %v2754_v63, 0.0 }
 0x7ab   : > { %1688 = vadd.xlane.f32.xlu2 %v1687_v0 }
 0x7c3   : > { %1706 = vrot.lane.b32.xlu2 %v1660_v48, %s3291_s26 }
 0x81e   : > { %v1689_v3 = vpop.xlane.xlu2 %1688 }
 0x81f   : > { %2755 = vrcp.f32 %v1689_v3  ;;  %v1701_v8 = vand.u32 2147483648, %v1689_v3  ;;  %v1699_v10 = vand.u32 2147483647, %v1689_v3  ;;  %vm1695_vm4 = vweird.f32 %v1689_v3 }
 0x821   : > { %v1702_v13 = vor.u32 1.1754944e-38, %v1701_v8  ;;  %vm1700_vm6 = vcmp.eq.f32.partialorder %v1699_v10, 8.507059e+37  ;;  %v2742_v8 = vld [vmem:[%s1296_s13] ss:$0 sm:$0xff] }
 0x825   : > { %v2756_v4 = vpop.eup %2755 }
 0x826   : > { %v1691_v5 = vmul.f32 %v2756_v4, %v1689_v3  ;;  %v1707_v6 = vpop.permute.xlu2 %1706  ;;  %vm1696_vm3 = vweird.f32 %v2756_v4 }
 0x827   : > { %1719 = vmatpush.bf16.msra.mxu3 %v1707_v6  ;;  %vm1697_vm5 = vmor %vm1695_vm4, %vm1696_vm3 }
 0x828   : > { %v1692_v7 = vsub.f32 1.0, %v1691_v5 }
 0x82a   : > { %v1693_v9 = vmul.f32 %v2756_v4, %v1692_v7 }
 0x82c   : > { %v1694_v11 = vadd.f32 %v2756_v4, %v1693_v9 }
 0x82e   : > { %v1698_v14 = vsel %vm1697_vm5, %v2756_v4, %v1694_v11 }
 0x82f   : > { %v1703_v15 = vsel %vm1700_vm6, %v1702_v13, %v1698_v14 }
 0x830   : > { %v1704_v16 = vmul.f32 %v2754_v63, %v1703_v15 }
 0x832   : > { %v1705_v17 = vpack.c.bf16 %v1704_v16, %v1704_v16 }
 0x834   : > { %2494 = vmatmul.msk.bf16.vlgmr.msra.gmra.mxu3 %vm1680_vm2, %v1705_v17 }
 0x8b7   : > { %v1721_v18 = vpop.f32.mrf.mxu3 }
 0x8b8   : > { %v1725_v19 = vpack.c.bf16 %v1721_v18, %v1721_v18 }
 0x8ba   : > { %2503 = vmatmul.msk.bf16.vlgmr.msra.gmra.mxu2 %vm1403_vm7, %v1725_v19 }
 0x8bf   : > { %v1723_v20 = vpop.f32.mrf.mxu3 }
 0x93d   : > { %v1758_v22 = vpop.f32.mrf.mxu2 }
 0x93e   : > { %v1759_v23 = vadd.f32 %v2738_v21, %v1758_v22 }
 0x940   : > { %v1762_v24 = vadd.f32 %v1759_v23, %v3866_v37  ;;  %v2586_v37 = vld [vmem:[%s3802_s29 + $0x30] sm:$0xff] }
 0x941   : > { %1913 = vmatpush.bf16.msrb.mxu1 %v2586_v37 }
 0x942   : > { %v1767_v25 = vsel %vm1403_vm7, %v1762_v24, 0.0 }
 0x943   : > { %1768 = vadd.xlane.f32.xlu1 %v1767_v25 }
 0x945   : > { %v1760_v26 = vpop.f32.mrf.mxu2  ;;  %1914 = vmatpush.bf16.msrb.mxu1 %v2585_v52 }
 0x949   : > { %1915 = vmatpush.bf16.msrb.mxu1 %v2584_v53 }
 0x94d   : > { %1916 = vmatpush.bf16.msrb.mxu1 %v2583_v54 }
 0x951   : > { %1917 = vmatpush.bf16.msrb.mxu1 %v2582_v55 }
 0x955   : > { %1918 = vmatpush.bf16.msrb.mxu1 %v2581_v56 }
 0x959   : > { %1919 = vmatpush.bf16.msrb.mxu1 %v2580_v57 }
 0x9b6   : > { %v1769_v27 = vpop.xlane.xlu1 %1768 }
 0x9b7   : > { %v1770_v28 = vmul.f32 %v1769_v27, %v3853_v12 }
 0x9b9   : > { %v1771_v29 = vsub.f32 %v1762_v24, %v1770_v28 }
 0x9bb   : > { %v1772_v30 = vmul.f32 %v1771_v29, %v1771_v29 }
 0x9bd   : > { %v1773_v31 = vsel %vm1403_vm7, %v1772_v30, 0.0 }
 0x9be   : > { %1774 = vadd.xlane.f32.xlu0 %v1773_v31  ;;  %v2744_v31 = vld [vmem:[%s4142_s10 + $0x2] ss:$0 sm:$0xff] }
 0xa31   : > { %v1775_v35 = vpop.xlane.xlu0 %1774 }
 0xa32   : > { %v1776_v36 = vmul.f32 %v1775_v35, %v3853_v12 }
 0xa34   : > { %v1777_v38 = vadd.f32 1e-05, %v1776_v36 }
 0xa36   : > { %2757 = vrsqrt.f32 %v1777_v38  ;;  %vm1784_vm9 = vweird.f32 %v1777_v38 }
 0xa3c   : > { %v2758_v39 = vpop.eup %2757 }
 0xa3d   : > { %v1779_v40 = vmul.f32 %v2758_v39, %v1777_v38  ;;  %vm1785_vm8 = vweird.f32 %v2758_v39 }
 0xa3e   : > { %vm1786_vm10 = vmor %vm1784_vm9, %vm1785_vm8 }
 0xa3f   : > { %v1780_v41 = vmul.f32 %v2758_v39, %v1779_v40 }
 0xa41   : > { %v1781_v42 = vmul.f32 0.5, %v1780_v41 }
 0xa43   : > { %v1782_v43 = vsub.f32 1.5, %v1781_v42 }
 0xa45   : > { %v1783_v44 = vmul.f32 %v2758_v39, %v1782_v43 }
 0xa47   : > { %v1787_v46 = vsel %vm1786_vm10, %v2758_v39, %v1783_v44 }
 0xa48   : > { %v1788_v48 = vmul.f32 %v1787_v46, %v1771_v29  ;;  %v2743_v29 = vld [vmem:[%s4141_s0 + $0x2] ss:$0 sm:$0xff] }
 0xa4a   : > { %v1792_v49 = vmul.f32 %v2739_v45, %v1788_v48 }
 0xa4c   : > { %v1796_v50 = vadd.f32 %v2740_v47, %v1792_v49 }
 0xa4e   : > { %v1797_v51 = vpack.c.bf16 %v1796_v50, %v1796_v50 }
 0xa50   : > { %2514 = vmatmul.msk.bf16.vlgmr.msra.gmra.mxu0 %vm1403_vm7, %v1797_v51 }
 0xacd   : > { %v1830_v59 = vpop.f32.mrf.mxu0 }
 0xace   : > { %v1831_v60 = vadd.f32 %v2741_v58, %v1830_v59 }
 0xad0   : > { %v1835_v61 = vmul.f32 0.044715, %v1831_v60  ;;  %v1834_v4 = vmul.f32 0.5, %v1831_v60 }
 0xad2   : > { %v1836_v62 = vmul.f32 %v1835_v61, %v1831_v60 }
 0xad4   : > { %v1837_v63 = vmul.f32 %v1836_v62, %v1831_v60 }
 0xad5   : > { %v1832_v0 = vpop.f32.mrf.mxu0 }
 0xad6   : > { %v1838_v1 = vadd.f32 %v1837_v63, %v1831_v60 }
 0xad8   : > { %v1839_v2 = vmul.f32 0.7978846, %v1838_v1 }
 0xada   : > { %2759 = vtanh.f32 %v1839_v2 }
 0xae0   : > { %v2760_v3 = vpop.eup %2759 }
 0xae1   : > { %v1841_v5 = vadd.f32 1.0, %v2760_v3 }
 0xae3   : > { %v1842_v6 = vmul.f32 %v1841_v5, %v1834_v4 }
 0xae5   : > { %v1843_v7 = vpack.c.bf16 %v1842_v6, %v1842_v6 }
 0xae7   : > { %1920 = vmatmul.bf16.vlgmr.msrb.gmra.mxu1 %v1843_v7 }
 0xb64   : > { %v1921_v9 = vpop.f32.mrf.mxu1 }
 0xb65   : > { %v1922_v10 = vadd.f32 %v2742_v8, %v1921_v9 }
 0xb67   : > { %v1925_v11 = vadd.f32 %v1922_v10, %v1796_v50 }
 0xb69   : > { %v1930_v13 = vsel %vm1403_vm7, %v1925_v11, 0.0 }
 0xb6a   : > { %1931 = vadd.xlane.f32.xlu2 %v1930_v13 }
 0xb6c   : > { %v1923_v14 = vpop.f32.mrf.mxu1 }
 0xbdd   : > { %v1932_v15 = vpop.xlane.xlu2 %1931 }
 0xbde   : > { %v1933_v16 = vmul.f32 %v1932_v15, %v3853_v12 }
 0xbe0   : > { %v1934_v17 = vsub.f32 %v1925_v11, %v1933_v16 }
 0xbe2   : > { %v1935_v18 = vmul.f32 %v1934_v17, %v1934_v17 }
 0xbe4   : > { %v1936_v19 = vsel %vm1403_vm7, %v1935_v18, 0.0 }
 0xbe5   : > { %1937 = vadd.xlane.f32.xlu0 %v1936_v19 }
 0xc58   : > { %v1938_v20 = vpop.xlane.xlu0 %1937 }
 0xc59   : > { %v1939_v21 = vmul.f32 %v1938_v20, %v3853_v12 }
 0xc5b   : > { %v1940_v22 = vadd.f32 1e-05, %v1939_v21 }
 0xc5d   : > { %2761 = vrsqrt.f32 %v1940_v22  ;;  %vm1947_vm12 = vweird.f32 %v1940_v22 }
 0xc63   : > { %v2762_v23 = vpop.eup %2761 }
 0xc64   : > { %v1942_v24 = vmul.f32 %v2762_v23, %v1940_v22  ;;  %vm1948_vm11 = vweird.f32 %v2762_v23 }
 0xc65   : > { %vm1949_vm13 = vmor %vm1947_vm12, %vm1948_vm11 }
 0xc66   : > { %v1943_v25 = vmul.f32 %v2762_v23, %v1942_v24 }
 0xc68   : > { %v1944_v26 = vmul.f32 0.5, %v1943_v25 }
 0xc6a   : > { %v1945_v27 = vsub.f32 1.5, %v1944_v26 }
 0xc6c   : > { %v1946_v28 = vmul.f32 %v2762_v23, %v1945_v27 }
 0xc6e   : > { %v1950_v30 = vsel %vm1949_vm13, %v2762_v23, %v1946_v28 }
 0xc6f   : > { %v1951_v32 = vmul.f32 %v1950_v30, %v1934_v17 }
 0xc71   : > { %v1955_v33 = vmul.f32 %v2743_v29, %v1951_v32  ;;  %1964 = sbr.rel (%p2549_p13) target bundleno = 3459 (0xd83), region = 172 }
 0xc73   : > { %v1959_v34 = vadd.f32 %v2744_v31, %v1955_v33 }
 0xc75   : > { %1960 = vst.msk [vmem:[#allocation2] sm:$0xff] %vm1403_vm7, %v1959_v34 }
 0xc76   : > { %v1968_v35 = vsel %vm1403_vm7, %v1959_v34, 0.0  ;;  %v2763_v50 = vld [vmem:[%s4148_s9] ss:$0 sm:$0xff] }
 0xc77   : > { %1969 = vadd.xlane.f32.xlu0 %v1968_v35 }
 0xcea   : > { %v1970_v36 = vpop.xlane.xlu0 %1969 }
 0xceb   : > { %v1971_v37 = vmul.f32 %v1970_v36, %v3853_v12 }
 0xced   : > { %v1972_v38 = vsub.f32 %v1959_v34, %v1971_v37 }
 0xcef   : > { %v1973_v39 = vmul.f32 %v1972_v38, %v1972_v38 }
 0xcf1   : > { %v1974_v40 = vsel %vm1403_vm7, %v1973_v39, 0.0 }
 0xcf2   : > { %1975 = vadd.xlane.f32.xlu0 %v1974_v40 }
 0xd65   : > { %v1976_v41 = vpop.xlane.xlu0 %1975 }
 0xd66   : > { %v1977_v42 = vmul.f32 %v1976_v41, %v3853_v12  ;;  %v2764_v12 = vld [vmem:[%s4148_s9 + $0x1] ss:$0 sm:$0xff] }
 0xd68   : > { %v1978_v43 = vadd.f32 1e-05, %v1977_v42 }
 0xd6a   : > { %2765 = vrsqrt.f32 %v1978_v43  ;;  %vm1985_vm15 = vweird.f32 %v1978_v43 }
 0xd70   : > { %v2766_v44 = vpop.eup %2765 }
 0xd71   : > { %v1980_v45 = vmul.f32 %v2766_v44, %v1978_v43  ;;  %vm1986_vm14 = vweird.f32 %v2766_v44 }
 0xd72   : > { %vm1987_vm0 = vmor %vm1985_vm15, %vm1986_vm14 }
 0xd73   : > { %v1981_v46 = vmul.f32 %v2766_v44, %v1980_v45 }
 0xd75   : > { %v1982_v47 = vmul.f32 0.5, %v1981_v46 }
 0xd77   : > { %v1983_v48 = vsub.f32 1.5, %v1982_v47 }
 0xd79   : > { %v1984_v49 = vmul.f32 %v2766_v44, %v1983_v48 }
 0xd7b   : > { %v1988_v51 = vsel %vm1987_vm0, %v2766_v44, %v1984_v49 }
 0xd7c   : > { %v1989_v52 = vmul.f32 %v1988_v51, %v1972_v38 }
 0xd7e   : > { %v1993_v53 = vmul.f32 %v2763_v50, %v1989_v52 }
 0xd80   : > { %v1997_v54 = vadd.f32 %v2764_v12, %v1993_v53 }
 0xd82   : > { %1998 = vst.msk [vmem:[%s3811_s12] sm:$0xff] %vm1403_vm7, %v1997_v54 }
 0xd83 PF: > { %s4149_s19 = sld [smem:[#allocation42_spill]]  ;;  %s2012_s30 = sshll.u32 %s3811_s12, 4  ;;  %s2013_s30 = int_to_ptr.vmem [resolvable:$true] %s2012_s30 }
 0xd84   : > { %s4151_s4 = sld [smem:[#allocation79_spill]]  ;;  %s2000_s3 = scalar_lea.sflag [#allocation7], %s3696_s28 }
 0xd89   : > { %s2552_s6 = sshll.u32 %s4149_s19, 3 }
 0xd8a   : > { %s4152_s23 = smov %s4151_s4  ;;  %s2010_s7 = scalar_lea.hbm %s4151_s4, %s2552_s6 }
 0xd8b   : > { %s2014_s1 = sshll.u32 %s2010_s7, 4  ;;  %s3153_s10 = scalar_lea.hbm %s4152_s23, 16  ;;  %s2015_s1 = int_to_ptr.hbm [resolvable:$true] %s2014_s1 }
 0xd8c   : > { %s3147_s26 = sshra.s32 %s2015_s1, 4  ;;  %s3148_s26 = int_to_ptr.hbm [resolvable:$true] %s3147_s26 }
 0xd8d   : > { %s3149_s15 = scalar_lea.hbm %s3148_s26, 8  ;;  %p3154_p2 = scmp.lt.s32.totalorder %s3148_s26, %s4152_s23 }
 0xd8e   : > { %p3150_p0 = scmp.ne.s32.totalorder %s3148_s26, %s3149_s15  ;;  %p3155_p9 = scmp.lt.s32.totalorder %s3153_s10, %s3149_s15 }
 0xd90   : > { %p3151_p5 = pnand %p3150_p0, %p3538_p8  ;;  %p3156_p7 = por %p3155_p9, %p3154_p2 }
 0xd92   : > { %p3152_p10 = pneg %p3151_p5 }
 0xd94   : > { %p3157_p11 = pnand %p3156_p7, %p3152_p10 }
 0xd96   : > { %3160 = shalt.err (!%p3157_p11)
}
 0xd97   : > { %2621 = dma.vmem_to_hbm [thread:$0]  (%p3538_p8), %s2013_s30, 128, %s2015_s1, %s2000_s3  }
 0xd98 PF: > { %s4153_s28 = sld [smem:[#allocation45_spill]] }
 0xd99   : > { %s4154_s12 = sld [smem:[#allocation38_spill]] }
 0xd9e   : > { %p2633_p1 = scmp.ge.s32.totalorder %s4153_s28, 2 }
 0xd9f   : > { %s2026_s11 = sand.u32 1, %s4154_s12  }
 0xda0   : > { %p2628_p4 = pnand %p2633_p1, %p3545_p3  ;;  %s2027_s21 = scalar_lea.sflag [#allocation7], %s2026_s11 }
 0xda2   : > { %p2629_p6 = pneg %p2628_p4 }
 0xda4   : > { %3238 = dma.done.wait (%p2629_p6), %s2027_s21, 128  }
 0xda5   : > { %3240 = vsyncadd (%p2629_p6), %s2027_s21, 4294967168  ;;  %s57_s7 = sadd.s32 1, %s4153_s28   ;;  %s4156_s4 = sld [smem:[#allocation36_spill]] }
 0xda6   : > { %p54_p12 = scmp.ge.s32.totalorder %s57_s7, 6   ;;  %s4157_s30 = sld [smem:[#allocation37_spill]] }
 0xda7   : > { %s4158_s24 = sld [smem:[#allocation49_spill]] }
 0xda8   : > { %s4159_s25 = sld [smem:[#allocation39_spill]] }
 0xda9   : > { %s4160_s5 = sld [smem:[#allocation40_spill]] }
 0xdaa   : > { %s4161_s1 = sld [smem:[#allocation50_spill]]  ;;  %56 = sbr.rel (!%p54_p12) target bundleno = 46 (0x2e), region = 331 }
 0xdab   : > { %s4162_s26 = sld [smem:[#allocation43_spill]] }
 0xdac   : > { %s4163_s2 = sld [smem:[#allocation44_spill]] }
 0xdad   : > { %s4164_s6 = sld [smem:[#allocation47_spill]] }
 0xdae   : > { %s4165_s27 = sld [smem:[#allocation48_spill]] }
 0xdaf   :  { %2033 = vsyncpa [#allocation6], 1 }
 0xdb0   :  { %2035 = vsyncpa [#allocation6 + $0x1], 1 }
 0xdb1   :  { %2036 = vsyncpa [#allocation9], 1 }
 0xdb2   :  { %2038 = vsyncpa [#allocation9 + $0x1], 1 }
 0xdb3   :  { %2039 = vsyncpa [#allocation12], 1 }
 0xdb4   :  { %2041 = vsyncpa [#allocation12 + $0x1], 1 }
 0xdb5   :  { %2042 = vsyncpa [#allocation15], 1 }
 0xdb6   :  { %2044 = vsyncpa [#allocation15 + $0x1], 1 }
 0xdb7   :  { %2045 = vsyncpa [#allocation18], 1 }
 0xdb8   :  { %2047 = vsyncpa [#allocation18 + $0x1], 1 }
 0xdb9   :  { %2048 = vsyncpa [#allocation21], 1 }
 0xdba   :  { %2050 = vsyncpa [#allocation21 + $0x1], 1 }
 0xdbb   :  { %2051 = vsyncpa [#allocation24], 1 }
 0xdbc   :  { %2053 = vsyncpa [#allocation24 + $0x1], 1 }
 0xdbd   :  { %2054 = vsyncpa [#allocation7], 1 }
 0xdbe   :  { %2056 = vsyncpa [#allocation7 + $0x1], 1 }

</bundles_post_ra>
